<compile_context>
chip_gen: v7x
topology: tpu7x:2x2x1
jax: 0.10.0
libtpu: 0.0.40
codegen_flags: <defaults>
</compile_context>

<pallas_src>
import jax
import jax.numpy as jnp
from jax import lax
from jax.experimental import pallas as pl
from jax.experimental.pallas import tpu as pltpu

# ----------------------------- problem constants ----------------------------
INP, HID, OUP = 16, 32, 16
KS = 3
PAD = (KS - 1) // 2
SE_DIM = 8                      # _make_divisible(HID // 4, 8) == 8
N, H, W = 2, 12, 8              # small synthetic shapes
NR = N * H                      # packed rows            = 24
NLI = W * INP                   # packed input lanes     = 128
NL = W * HID                    # packed hidden lanes    = 256
NLO = W * OUP                   # packed output lanes    = 128

assert NR % 8 == 0 and NLI % 128 == 0 and NL % 128 == 0 and NLO % 128 == 0

# ----------------------- f32 parameter-slab row layout ----------------------
ROW_B1, ROW_B2, ROW_SEB1, ROW_SEB2, ROW_B3 = 0, 1, 2, 3, 4
ROW_TAPS = 8                    # rows  8..16 : (9, NL) dw taps (BN2 scale + w-edge mask folded)
ROW_SEW1 = 24                   # rows 24..55 : (HID, SE_DIM) SE fc1 weight
ROW_SEW2 = 56                   # rows 56..63 : (SE_DIM, NL) SE fc2 weight tiled over w
ROW_RC = 64                     # rows 64..87 : lanes 0:2 gate row-broadcast selector, 2:4 h-edge masks
ROW_SPOOL = 88                  # rows 88..89 : (N, NR) pooling selector with 1/(H*W) folded
P_ROWS = 96


def _hswish(y):
    return y * jnp.clip(y + 3.0, 0.0, 6.0) * (1.0 / 6.0)


# --------------------- single fused kernel (no grid) ------------------------
def fused_block_kernel(x_ref, w_ref, p_ref, o_ref):
    f32 = jnp.float32
    hp = lax.Precision.HIGHEST

    # ---- 1x1 expand conv (BN1 scale folded into block-diagonal weight) + h_swish
    x_bf = x_ref[...].astype(jnp.bfloat16)                               # (24, 128)
    y = jnp.dot(x_bf, w_ref[0:NLI, :], preferred_element_type=f32)       # (24, 256) f32
    y = _hswish(y + p_ref[ROW_B1:ROW_B1 + 1, :])

    # ---- 3x3 depthwise conv (stride 1, BN2 scale folded) via rolls + masks -
    hm = p_ref[ROW_RC:ROW_RC + NR, N:N + 2]                              # (24, 2) h-edge masks
    y_up = pltpu.roll(y, 1, axis=0) * hm[:, 0:1]                         # source row h-1
    y_dn = pltpu.roll(y, NR - 1, axis=0) * hm[:, 1:2]                    # source row h+1
    rows = (y_up, y, y_dn)
    taps = p_ref[ROW_TAPS:ROW_TAPS + KS * KS, :]                         # (9, 256)
    acc = jnp.zeros((NR, NL), f32)
    for i in range(KS):
        base = rows[i]
        for j in range(KS):
            shift = (-HID * (j - PAD)) % NL                              # dx -> lane roll by HID
            shifted = base if shift == 0 else pltpu.roll(base, shift, axis=1)
            acc = acc + shifted * taps[i * KS + j:i * KS + j + 1, :]
    y_dw = acc + p_ref[ROW_B2:ROW_B2 + 1, :]                             # + BN2 bias, (24, 256)

    # ---- SE: avg-pool (MXU row-reduce + XLU lane-reduce) -> FC/ReLU/FC/h_sigmoid
    spool = p_ref[ROW_SPOOL:ROW_SPOOL + N, 0:NR]                         # (2, 24), 1/(H*W) folded
    red = jnp.dot(spool, y_dw, preferred_element_type=f32, precision=hp)  # (2, 256) per-image row sums
    half = NL // 2
    while half >= HID:                                                   # reduce the W lane-groups
        red = red + pltpu.roll(red, NL - half, axis=1)
        half //= 2
    pooled = red[:, 0:HID]                                               # (2, 32) channel means
    sw1 = p_ref[ROW_SEW1:ROW_SEW1 + HID, 0:SE_DIM]                       # (32, 8)
    sb1 = p_ref[ROW_SEB1:ROW_SEB1 + 1, 0:SE_DIM]
    hvec = jnp.maximum(
        jnp.dot(pooled, sw1, preferred_element_type=f32, precision=hp) + sb1, 0.0)
    sw2 = p_ref[ROW_SEW2:ROW_SEW2 + SE_DIM, :]                           # (8, 256) tiled over w
    g = jnp.dot(hvec, sw2, preferred_element_type=f32, precision=hp) \
        + p_ref[ROW_SEB2:ROW_SEB2 + 1, :]
    g = jnp.clip(g + 3.0, 0.0, 6.0) * (1.0 / 6.0)                        # h_sigmoid, (2, 256)
    bbc = p_ref[ROW_RC:ROW_RC + NR, 0:N]                                 # (24, 2) row selector
    g_pk = jnp.dot(bbc, g, preferred_element_type=f32, precision=hp)     # (24, 256) gate broadcast
    y_act = _hswish(y_dw * g_pk)

    # ---- 1x1 project conv (BN3 scale folded, block-diagonal) + residual ----
    w3b = w_ref[NLI:NLI + NL, 0:NLO]                                     # (256, 128) bf16
    proj = jnp.dot(y_act.astype(jnp.bfloat16), w3b, preferred_element_type=f32)
    # Re-read x here (instead of reusing the value loaded at the top) to keep
    # register pressure low across the depthwise / SE sections.
    o_ref[...] = proj + p_ref[ROW_B3:ROW_B3 + 1, 0:NLO] + x_ref[...]


# ------------------------------- wrapper ------------------------------------
@jax.jit
def inverted_residual(x_nchw, p):
    # NCHW -> NHWC -> packed (N*H, W*INP); pure layout plumbing on the XLA side.
    x = jnp.transpose(x_nchw, (0, 2, 3, 1)).astype(jnp.float32)
    x_pk = x.reshape(NR, NLI)                                            # (24, 128)

    # Fold inference-mode BN scales into the conv weights.
    w1f = p["w1"] * p["bn1_s"]                                           # (16, 32)
    wdwf = p["wdw"] * p["bn2_s"]                                         # (9, 32)
    w3f = p["w3"] * p["bn3_s"]                                           # (32, 16)

    # Block-diagonal 1x1-conv weights so the matmuls operate directly on the
    # lane-packed layout (built once; in a real model this is done at load time).
    eye_w = jnp.eye(W, dtype=jnp.float32)
    w1_blk = jnp.einsum("wv,io->wivo", eye_w, w1f).reshape(NLI, NL)      # (128, 256)
    w3_blk = jnp.einsum("wv,io->wivo", eye_w, w3f).reshape(NL, NLO)      # (256, 128)
    wslab = jnp.zeros((NLI + NL, NL), jnp.float32)
    wslab = wslab.at[0:NLI, :].set(w1_blk)
    wslab = wslab.at[NLI:, 0:NLO].set(w3_blk)
    wslab = wslab.astype(jnp.bfloat16)                                   # bf16 MXU operands

    # Depthwise taps with the w-edge (left/right padding) masks folded in.
    oxs = jnp.arange(KS * KS) % KS - PAD                                 # (9,)
    wpos = jnp.arange(W)
    lane_ok = ((wpos[None, :] + oxs[:, None] >= 0) &
               (wpos[None, :] + oxs[:, None] < W)).astype(jnp.float32)   # (9, W)
    taps = (lane_ok[:, :, None] * wdwf[:, None, :]).reshape(KS * KS, NL)

    # Pooling / broadcast selectors and h-edge (top/bottom padding) masks.
    rr = jnp.arange(NR)
    spool = (rr[None, :] // H == jnp.arange(N)[:, None]).astype(jnp.float32) / (H * W)  # (2, 24)
    bbc = (rr[:, None] // H == jnp.arange(N)[None, :]).astype(jnp.float32)              # (24, 2)
    hh = rr % H
    hmask = jnp.stack([hh > 0, hh < H - 1], axis=1).astype(jnp.float32)                 # (24, 2)

    # Single f32 parameter slab (one DMA), statically sliced inside the kernel.
    pslab = jnp.zeros((P_ROWS, NL), jnp.float32)
    pslab = pslab.at[ROW_B1, :].set(jnp.tile(p["bn1_b"][0], W))
    pslab = pslab.at[ROW_B2, :].set(jnp.tile(p["bn2_b"][0], W))
    pslab = pslab.at[ROW_SEB1, 0:SE_DIM].set(p["se_b1"][0])
    pslab = pslab.at[ROW_SEB2, :].set(jnp.tile(p["se_b2"][0], W))
    pslab = pslab.at[ROW_B3, 0:NLO].set(jnp.tile(p["bn3_b"][0], W))
    pslab = pslab.at[ROW_TAPS:ROW_TAPS + KS * KS, :].set(taps)
    pslab = pslab.at[ROW_SEW1:ROW_SEW1 + HID, 0:SE_DIM].set(p["se_w1"])
    pslab = pslab.at[ROW_SEW2:ROW_SEW2 + SE_DIM, :].set(jnp.tile(p["se_w2"], (1, W)))
    pslab = pslab.at[ROW_RC:ROW_RC + NR, 0:N].set(bbc)
    pslab = pslab.at[ROW_RC:ROW_RC + NR, N:N + 2].set(hmask)
    pslab = pslab.at[ROW_SPOOL:ROW_SPOOL + N, 0:NR].set(spool)

    vmem = pl.BlockSpec(memory_space=pltpu.MemorySpace.VMEM)
    o_pk = pl.pallas_call(
        fused_block_kernel,
        out_shape=jax.ShapeDtypeStruct((NR, NLO), jnp.float32),          # lane-dense output
        in_specs=[vmem, vmem, vmem],
        out_specs=vmem,
    )(x_pk, wslab, pslab)

    return jnp.transpose(o_pk.reshape(N, H, W, OUP), (0, 3, 1, 2))       # back to NCHW


# ------------------------------- test setup ---------------------------------
def make_params(key):
    ks = jax.random.split(key, 10)

    def bn_fold(k, ch):
        k1, k2, k3, k4 = jax.random.split(k, 4)
        gamma = 1.0 + 0.1 * jax.random.normal(k1, (ch,), jnp.float32)
        beta = 0.1 * jax.random.normal(k2, (ch,), jnp.float32)
        mean = 0.1 * jax.random.normal(k3, (ch,), jnp.float32)
        var = jnp.abs(jax.random.normal(k4, (ch,), jnp.float32)) + 0.5
        scale = gamma / jnp.sqrt(var + 1e-5)
        bias = beta - mean * scale
        return scale.reshape(1, ch), bias.reshape(1, ch)

    p = {}
    # 1x1 expand conv weight, stored as (Cin, Chid) (== PyTorch (Chid,Cin,1,1).T)
    p["w1"] = 0.2 * jax.random.normal(ks[0], (INP, HID), jnp.float32)
    p["bn1_s"], p["bn1_b"] = bn_fold(ks[1], HID)
    # depthwise weight, stored as (K*K, Chid) (== PyTorch (Chid,1,K,K) per-tap)
    p["wdw"] = 0.2 * jax.random.normal(ks[2], (KS * KS, HID), jnp.float32)
    p["bn2_s"], p["bn2_b"] = bn_fold(ks[3], HID)
    # SE: Linear(HID, SE_DIM) + ReLU + Linear(SE_DIM, HID) + h_sigmoid
    p["se_w1"] = 0.2 * jax.random.normal(ks[4], (HID, SE_DIM), jnp.float32)
    p["se_b1"] = 0.1 * jax.random.normal(ks[5], (1, SE_DIM), jnp.float32)
    p["se_w2"] = 0.2 * jax.random.normal(ks[6], (SE_DIM, HID), jnp.float32)
    p["se_b2"] = 0.1 * jax.random.normal(ks[7], (1, HID), jnp.float32)
    # 1x1 project conv weight, stored as (Chid, Cout)
    p["w3"] = 0.2 * jax.random.normal(ks[8], (HID, OUP), jnp.float32)
    p["bn3_s"], p["bn3_b"] = bn_fold(ks[9], OUP)
    return p


def ref_forward(x_nchw, p):
    """Pure-JAX reference (NCHW in/out).  The 1x1 convs use bf16 operands with
    f32 accumulation, matching the kernel's (and default TPU conv) MXU behavior;
    everything else is f32."""
    hp = lax.Precision.HIGHEST
    f32, bf16 = jnp.float32, jnp.bfloat16
    x = jnp.transpose(x_nchw, (0, 2, 3, 1)).astype(f32)                  # NHWC
    w1f = (p["w1"] * p["bn1_s"]).astype(bf16)
    y = jnp.dot(x.reshape(-1, INP).astype(bf16), w1f,
                preferred_element_type=f32, precision=hp).reshape(N, H, W, HID)
    y = _hswish(y + p["bn1_b"][0])
    yp = jnp.pad(y, ((0, 0), (PAD, PAD), (PAD, PAD), (0, 0)))
    wdwf = p["wdw"] * p["bn2_s"]
    acc = jnp.zeros_like(y)
    for i in range(KS):
        for j in range(KS):
            acc = acc + yp[:, i:i + H, j:j + W, :] * wdwf[i * KS + j]
    y = acc + p["bn2_b"][0]
    pooled = jnp.mean(y, axis=(1, 2))                                    # (N, HID)
    hvec = jnp.maximum(jnp.dot(pooled, p["se_w1"], precision=hp) + p["se_b1"][0], 0.0)
    g = jnp.dot(hvec, p["se_w2"], precision=hp) + p["se_b2"][0]
    g = jnp.clip(g + 3.0, 0.0, 6.0) / 6.0
    y = _hswish(y * g[:, None, None, :])
    w3f = (p["w3"] * p["bn3_s"]).astype(bf16)
    z = jnp.dot(y.reshape(-1, HID).astype(bf16), w3f,
                preferred_element_type=f32, precision=hp).reshape(N, H, W, OUP)
    z = z + p["bn3_b"][0]
    return jnp.transpose(x + z, (0, 3, 1, 2))


if __name__ == "__main__":
    key = jax.random.PRNGKey(0)
    kx, kp = jax.random.split(key)
    x = jax.random.normal(kx, (N, INP, H, W), jnp.float32)               # NCHW like PyTorch
    params = make_params(kp)

    out = jax.block_until_ready(inverted_residual(x, params))
    ref = ref_forward(x, params)

    assert out.shape == (N, OUP, H, W), out.shape
    assert bool(jnp.max(jnp.abs(out - ref)) < 1e-2), "mismatch vs reference"
    print("KERNEL_OK")
</pallas_src>

<mosaic_0001>
module attributes {stable_mosaic.version = 11 : i64} {
  func.func @fused_block_kernel(%arg0: memref<24x128xf32, #tpu.memory_space<vmem>>, %arg1: memref<384x256xbf16, #tpu.memory_space<vmem>>, %arg2: memref<96x256xf32, #tpu.memory_space<vmem>>, %arg3: memref<24x128xf32, #tpu.memory_space<vmem>>) attributes {dimension_semantics = [], scalar_prefetch = 0 : i64, scratch_operands = 0 : i64, tpu.core_type = #tpu.core_type<tc>} {
    %c0 = arith.constant 0 : index
    %c0_0 = arith.constant 0 : index
    %0 = vector.load %arg0[%c0, %c0_0] : memref<24x128xf32, #tpu.memory_space<vmem>>, vector<24x128xf32>
    %1 = arith.truncf %0 : vector<24x128xf32> to vector<24x128xbf16>
    %c0_1 = arith.constant 0 : index
    %c0_2 = arith.constant 0 : index
    %2 = vector.load %arg1[%c0_1, %c0_2] : memref<384x256xbf16, #tpu.memory_space<vmem>>, vector<128x256xbf16>
    %cst = arith.constant dense<0.000000e+00> : vector<24x256xf32>
    %3 = tpu.matmul %1, %2, %cst {dimension_numbers = #tpu.dot_dimension_numbers<[1], [0], [0], [1], [0, 0, 1, 1], [], []>} : vector<24x128xbf16>, vector<128x256xbf16>, vector<24x256xf32> -> vector<24x256xf32>
    %c0_3 = arith.constant 0 : index
    %c0_4 = arith.constant 0 : index
    %4 = vector.load %arg2[%c0_3, %c0_4] : memref<96x256xf32, #tpu.memory_space<vmem>>, vector<1x256xf32>
    %5 = vector.broadcast %4 : vector<1x256xf32> to vector<24x256xf32>
    %6 = arith.addf %3, %5 : vector<24x256xf32>
    %cst_5 = arith.constant 3.000000e+00 : f32
    %7 = vector.broadcast %cst_5 : f32 to vector<24x256xf32>
    %8 = arith.addf %6, %7 : vector<24x256xf32>
    %cst_6 = arith.constant 0.000000e+00 : f32
    %cst_7 = arith.constant 6.000000e+00 : f32
    %9 = vector.broadcast %cst_6 : f32 to vector<24x256xf32>
    %10 = arith.maximumf %9, %8 : vector<24x256xf32>
    %11 = vector.broadcast %cst_7 : f32 to vector<24x256xf32>
    %12 = arith.minimumf %11, %10 : vector<24x256xf32>
    %13 = arith.mulf %6, %12 : vector<24x256xf32>
    %cst_8 = arith.constant 0.166666672 : f32
    %14 = vector.broadcast %cst_8 : f32 to vector<24x256xf32>
    %15 = arith.mulf %13, %14 : vector<24x256xf32>
    %c64 = arith.constant 64 : index
    %c2 = arith.constant 2 : index
    %16 = vector.load %arg2[%c64, %c2] : memref<96x256xf32, #tpu.memory_space<vmem>>, vector<24x2xf32>
    %c1_i32 = arith.constant 1 : i32
    %17 = tpu.dynamic_rotate %15 by %c1_i32 dim 0 : vector<24x256xf32>, i32 -> vector<24x256xf32>
    %18 = vector.extract_strided_slice %16 {offsets = [0, 0], sizes = [24, 1], strides = [1, 1]} : vector<24x2xf32> to vector<24x1xf32>
    %19 = vector.broadcast %18 : vector<24x1xf32> to vector<24x256xf32>
    %20 = arith.mulf %17, %19 : vector<24x256xf32>
    %c23_i32 = arith.constant 23 : i32
    %21 = tpu.dynamic_rotate %15 by %c23_i32 dim 0 : vector<24x256xf32>, i32 -> vector<24x256xf32>
    %22 = vector.extract_strided_slice %16 {offsets = [0, 1], sizes = [24, 1], strides = [1, 1]} : vector<24x2xf32> to vector<24x1xf32>
    %23 = vector.broadcast %22 : vector<24x1xf32> to vector<24x256xf32>
    %24 = arith.mulf %21, %23 : vector<24x256xf32>
    %c8 = arith.constant 8 : index
    %c0_9 = arith.constant 0 : index
    %25 = vector.load %arg2[%c8, %c0_9] : memref<96x256xf32, #tpu.memory_space<vmem>>, vector<9x256xf32>
    %cst_10 = arith.constant 0.000000e+00 : f32
    %26 = vector.broadcast %cst_10 : f32 to vector<24x256xf32>
    %c32_i32 = arith.constant 32 : i32
    %27 = tpu.dynamic_rotate %20 by %c32_i32 dim 1 : vector<24x256xf32>, i32 -> vector<24x256xf32>
    %28 = vector.extract_strided_slice %25 {offsets = [0, 0], sizes = [1, 256], strides = [1, 1]} : vector<9x256xf32> to vector<1x256xf32>
    %29 = vector.broadcast %28 : vector<1x256xf32> to vector<24x256xf32>
    %30 = arith.mulf %27, %29 : vector<24x256xf32>
    %31 = arith.addf %26, %30 : vector<24x256xf32>
    %32 = vector.extract_strided_slice %25 {offsets = [1, 0], sizes = [1, 256], strides = [1, 1]} : vector<9x256xf32> to vector<1x256xf32>
    %33 = vector.broadcast %32 : vector<1x256xf32> to vector<24x256xf32>
    %34 = arith.mulf %20, %33 : vector<24x256xf32>
    %35 = arith.addf %31, %34 : vector<24x256xf32>
    %c224_i32 = arith.constant 224 : i32
    %36 = tpu.dynamic_rotate %20 by %c224_i32 dim 1 : vector<24x256xf32>, i32 -> vector<24x256xf32>
    %37 = vector.extract_strided_slice %25 {offsets = [2, 0], sizes = [1, 256], strides = [1, 1]} : vector<9x256xf32> to vector<1x256xf32>
    %38 = vector.broadcast %37 : vector<1x256xf32> to vector<24x256xf32>
    %39 = arith.mulf %36, %38 : vector<24x256xf32>
    %40 = arith.addf %35, %39 : vector<24x256xf32>
    %c32_i32_11 = arith.constant 32 : i32
    %41 = tpu.dynamic_rotate %15 by %c32_i32_11 dim 1 : vector<24x256xf32>, i32 -> vector<24x256xf32>
    %42 = vector.extract_strided_slice %25 {offsets = [3, 0], sizes = [1, 256], strides = [1, 1]} : vector<9x256xf32> to vector<1x256xf32>
    %43 = vector.broadcast %42 : vector<1x256xf32> to vector<24x256xf32>
    %44 = arith.mulf %41, %43 : vector<24x256xf32>
    %45 = arith.addf %40, %44 : vector<24x256xf32>
    %46 = vector.extract_strided_slice %25 {offsets = [4, 0], sizes = [1, 256], strides = [1, 1]} : vector<9x256xf32> to vector<1x256xf32>
    %47 = vector.broadcast %46 : vector<1x256xf32> to vector<24x256xf32>
    %48 = arith.mulf %15, %47 : vector<24x256xf32>
    %49 = arith.addf %45, %48 : vector<24x256xf32>
    %c224_i32_12 = arith.constant 224 : i32
    %50 = tpu.dynamic_rotate %15 by %c224_i32_12 dim 1 : vector<24x256xf32>, i32 -> vector<24x256xf32>
    %51 = vector.extract_strided_slice %25 {offsets = [5, 0], sizes = [1, 256], strides = [1, 1]} : vector<9x256xf32> to vector<1x256xf32>
    %52 = vector.broadcast %51 : vector<1x256xf32> to vector<24x256xf32>
    %53 = arith.mulf %50, %52 : vector<24x256xf32>
    %54 = arith.addf %49, %53 : vector<24x256xf32>
    %c32_i32_13 = arith.constant 32 : i32
    %55 = tpu.dynamic_rotate %24 by %c32_i32_13 dim 1 : vector<24x256xf32>, i32 -> vector<24x256xf32>
    %56 = vector.extract_strided_slice %25 {offsets = [6, 0], sizes = [1, 256], strides = [1, 1]} : vector<9x256xf32> to vector<1x256xf32>
    %57 = vector.broadcast %56 : vector<1x256xf32> to vector<24x256xf32>
    %58 = arith.mulf %55, %57 : vector<24x256xf32>
    %59 = arith.addf %54, %58 : vector<24x256xf32>
    %60 = vector.extract_strided_slice %25 {offsets = [7, 0], sizes = [1, 256], strides = [1, 1]} : vector<9x256xf32> to vector<1x256xf32>
    %61 = vector.broadcast %60 : vector<1x256xf32> to vector<24x256xf32>
    %62 = arith.mulf %24, %61 : vector<24x256xf32>
    %63 = arith.addf %59, %62 : vector<24x256xf32>
    %c224_i32_14 = arith.constant 224 : i32
    %64 = tpu.dynamic_rotate %24 by %c224_i32_14 dim 1 : vector<24x256xf32>, i32 -> vector<24x256xf32>
    %65 = vector.extract_strided_slice %25 {offsets = [8, 0], sizes = [1, 256], strides = [1, 1]} : vector<9x256xf32> to vector<1x256xf32>
    %66 = vector.broadcast %65 : vector<1x256xf32> to vector<24x256xf32>
    %67 = arith.mulf %64, %66 : vector<24x256xf32>
    %68 = arith.addf %63, %67 : vector<24x256xf32>
    %c1 = arith.constant 1 : index
    %c0_15 = arith.constant 0 : index
    %69 = vector.load %arg2[%c1, %c0_15] : memref<96x256xf32, #tpu.memory_space<vmem>>, vector<1x256xf32>
    %70 = vector.broadcast %69 : vector<1x256xf32> to vector<24x256xf32>
    %71 = arith.addf %68, %70 : vector<24x256xf32>
    %c88 = arith.constant 88 : index
    %c0_16 = arith.constant 0 : index
    %72 = vector.load %arg2[%c88, %c0_16] : memref<96x256xf32, #tpu.memory_space<vmem>>, vector<2x24xf32>
    %cst_17 = arith.constant dense<0.000000e+00> : vector<2x256xf32>
    %73 = tpu.matmul %72, %71, %cst_17 {dimension_numbers = #tpu.dot_dimension_numbers<[1], [0], [0], [1], [0, 0, 1, 1], [], []>, precision = #tpu.contract_precision<fp32>} : vector<2x24xf32>, vector<24x256xf32>, vector<2x256xf32> -> vector<2x256xf32>
    %c128_i32 = arith.constant 128 : i32
    %74 = tpu.dynamic_rotate %73 by %c128_i32 dim 1 : vector<2x256xf32>, i32 -> vector<2x256xf32>
    %75 = arith.addf %73, %74 : vector<2x256xf32>
    %c192_i32 = arith.constant 192 : i32
    %76 = tpu.dynamic_rotate %75 by %c192_i32 dim 1 : vector<2x256xf32>, i32 -> vector<2x256xf32>
    %77 = arith.addf %75, %76 : vector<2x256xf32>
    %c224_i32_18 = arith.constant 224 : i32
    %78 = tpu.dynamic_rotate %77 by %c224_i32_18 dim 1 : vector<2x256xf32>, i32 -> vector<2x256xf32>
    %79 = arith.addf %77, %78 : vector<2x256xf32>
    %80 = vector.extract_strided_slice %79 {offsets = [0, 0], sizes = [2, 32], strides = [1, 1]} : vector<2x256xf32> to vector<2x32xf32>
    %c24 = arith.constant 24 : index
    %c0_19 = arith.constant 0 : index
    %81 = vector.load %arg2[%c24, %c0_19] : memref<96x256xf32, #tpu.memory_space<vmem>>, vector<32x8xf32>
    %c2_20 = arith.constant 2 : index
    %c0_21 = arith.constant 0 : index
    %82 = vector.load %arg2[%c2_20, %c0_21] : memref<96x256xf32, #tpu.memory_space<vmem>>, vector<1x8xf32>
    %cst_22 = arith.constant dense<0.000000e+00> : vector<2x8xf32>
    %83 = tpu.matmul %80, %81, %cst_22 {dimension_numbers = #tpu.dot_dimension_numbers<[1], [0], [0], [1], [0, 0, 1, 1], [], []>, precision = #tpu.contract_precision<fp32>} : vector<2x32xf32>, vector<32x8xf32>, vector<2x8xf32> -> vector<2x8xf32>
    %84 = vector.broadcast %82 : vector<1x8xf32> to vector<2x8xf32>
    %85 = arith.addf %83, %84 : vector<2x8xf32>
    %cst_23 = arith.constant 0.000000e+00 : f32
    %86 = vector.broadcast %cst_23 : f32 to vector<2x8xf32>
    %87 = arith.maximumf %85, %86 : vector<2x8xf32>
    %c56 = arith.constant 56 : index
    %c0_24 = arith.constant 0 : index
    %88 = vector.load %arg2[%c56, %c0_24] : memref<96x256xf32, #tpu.memory_space<vmem>>, vector<8x256xf32>
    %cst_25 = arith.constant dense<0.000000e+00> : vector<2x256xf32>
    %89 = tpu.matmul %87, %88, %cst_25 {dimension_numbers = #tpu.dot_dimension_numbers<[1], [0], [0], [1], [0, 0, 1, 1], [], []>, precision = #tpu.contract_precision<fp32>} : vector<2x8xf32>, vector<8x256xf32>, vector<2x256xf32> -> vector<2x256xf32>
    %c3 = arith.constant 3 : index
    %c0_26 = arith.constant 0 : index
    %90 = vector.load %arg2[%c3, %c0_26] : memref<96x256xf32, #tpu.memory_space<vmem>>, vector<1x256xf32>
    %91 = vector.broadcast %90 : vector<1x256xf32> to vector<2x256xf32>
    %92 = arith.addf %89, %91 : vector<2x256xf32>
    %cst_27 = arith.constant 3.000000e+00 : f32
    %93 = vector.broadcast %cst_27 : f32 to vector<2x256xf32>
    %94 = arith.addf %92, %93 : vector<2x256xf32>
    %cst_28 = arith.constant 0.000000e+00 : f32
    %cst_29 = arith.constant 6.000000e+00 : f32
    %95 = vector.broadcast %cst_28 : f32 to vector<2x256xf32>
    %96 = arith.maximumf %95, %94 : vector<2x256xf32>
    %97 = vector.broadcast %cst_29 : f32 to vector<2x256xf32>
    %98 = arith.minimumf %97, %96 : vector<2x256xf32>
    %cst_30 = arith.constant 0.166666672 : f32
    %99 = vector.broadcast %cst_30 : f32 to vector<2x256xf32>
    %100 = arith.mulf %98, %99 : vector<2x256xf32>
    %c64_31 = arith.constant 64 : index
    %c0_32 = arith.constant 0 : index
    %101 = vector.load %arg2[%c64_31, %c0_32] : memref<96x256xf32, #tpu.memory_space<vmem>>, vector<24x2xf32>
    %cst_33 = arith.constant dense<0.000000e+00> : vector<24x256xf32>
    %102 = tpu.matmul %101, %100, %cst_33 {dimension_numbers = #tpu.dot_dimension_numbers<[1], [0], [0], [1], [0, 0, 1, 1], [], []>, precision = #tpu.contract_precision<fp32>} : vector<24x2xf32>, vector<2x256xf32>, vector<24x256xf32> -> vector<24x256xf32>
    %103 = arith.mulf %71, %102 : vector<24x256xf32>
    %cst_34 = arith.constant 3.000000e+00 : f32
    %104 = vector.broadcast %cst_34 : f32 to vector<24x256xf32>
    %105 = arith.addf %103, %104 : vector<24x256xf32>
    %cst_35 = arith.constant 0.000000e+00 : f32
    %cst_36 = arith.constant 6.000000e+00 : f32
    %106 = vector.broadcast %cst_35 : f32 to vector<24x256xf32>
    %107 = arith.maximumf %106, %105 : vector<24x256xf32>
    %108 = vector.broadcast %cst_36 : f32 to vector<24x256xf32>
    %109 = arith.minimumf %108, %107 : vector<24x256xf32>
    %110 = arith.mulf %103, %109 : vector<24x256xf32>
    %cst_37 = arith.constant 0.166666672 : f32
    %111 = vector.broadcast %cst_37 : f32 to vector<24x256xf32>
    %112 = arith.mulf %110, %111 : vector<24x256xf32>
    %c128 = arith.constant 128 : index
    %c0_38 = arith.constant 0 : index
    %113 = vector.load %arg1[%c128, %c0_38] : memref<384x256xbf16, #tpu.memory_space<vmem>>, vector<256x128xbf16>
    %114 = arith.truncf %112 : vector<24x256xf32> to vector<24x256xbf16>
    %cst_39 = arith.constant dense<0.000000e+00> : vector<24x128xf32>
    %115 = tpu.matmul %114, %113, %cst_39 {dimension_numbers = #tpu.dot_dimension_numbers<[1], [0], [0], [1], [0, 0, 1, 1], [], []>} : vector<24x256xbf16>, vector<256x128xbf16>, vector<24x128xf32> -> vector<24x128xf32>
    %c4 = arith.constant 4 : index
    %c0_40 = arith.constant 0 : index
    %116 = vector.load %arg2[%c4, %c0_40] : memref<96x256xf32, #tpu.memory_space<vmem>>, vector<1x128xf32>
    %117 = vector.broadcast %116 : vector<1x128xf32> to vector<24x128xf32>
    %118 = arith.addf %115, %117 : vector<24x128xf32>
    %c0_41 = arith.constant 0 : index
    %c0_42 = arith.constant 0 : index
    %119 = vector.load %arg0[%c0_41, %c0_42] : memref<24x128xf32, #tpu.memory_space<vmem>>, vector<24x128xf32>
    %120 = arith.addf %118, %119 : vector<24x128xf32>
    %c0_43 = arith.constant 0 : index
    %c0_44 = arith.constant 0 : index
    %121 = vector.load %arg3[%c0_43, %c0_44] : memref<24x128xf32, #tpu.memory_space<vmem>>, vector<24x128xf32>
    tpu.vector_store %arg3[%c0_43, %c0_44], %120 {strides = array<i32>} : memref<24x128xf32, #tpu.memory_space<vmem>>, vector<24x128xf32>,
    return
  }
}

</mosaic_0001>

<bundles_post_ra>
// kernel: tile.23
= control target key start
LH: loop header
LB: loop body
LE: loop exit
PB: predicated region body
PF: predicated region fallthrough
CT: control target
= control target key end

     0   :  { %s22_s0 = inlined_call_operand.vmem [shape: f32[32], index: 0, kind: input, shape index: {}]   ;;  %s23_s1 = inlined_call_operand.vmem [shape: f32[8,32], index: 1, kind: output, shape index: {}]  }
   0x1   :  { %v4_v0 = vld [vmem:[%s22_s0] ss:$0 sm:$0xff] }
   0x2   :  { %5 = vst [vmem:[%s23_s1] sm:$0xff] %v4_v0 }

// kernel: tile.35
= control target key start
LH: loop header
LB: loop body
LE: loop exit
PB: predicated region body
PF: predicated region fallthrough
CT: control target
= control target key end

     0   :  { %s22_s0 = inlined_call_operand.vmem [shape: f32[16], index: 0, kind: input, shape index: {}]   ;;  %s23_s1 = inlined_call_operand.vmem [shape: f32[8,16], index: 1, kind: output, shape index: {}]  }
   0x1   :  { %v4_v0 = vld [vmem:[%s22_s0] ss:$0 sm:$0xff] }
   0x2   :  { %5 = vst [vmem:[%s23_s1] sm:$0xff] %v4_v0 }

// kernel: inverted_residual.1
= control target key start
LH: loop header
LB: loop body
LE: loop exit
PB: predicated region body
PF: predicated region fallthrough
CT: control target
= control target key end

     0   :  { %v3256_v1 = vmov 0   ;;  %v3257_v2 = vmov 2   ;;  %v3258_v16 = vmov 3   ;;  %v38_v27 = vlaneseq  ;;  %s3259_s4 = smov 32   ;;  %s3260_s5 = smov 96   ;;  %s4086_s1 = inlined_call_operand.vmem [shape: bf16[384,256], index: 1, kind: input, shape index: {}]   ;;  %s4087_s2 = inlined_call_operand.vmem [shape: f32[96,256], index: 2, kind: input, shape index: {}]   ;;  %s4088_s0 = inlined_call_operand.vmem [shape: f32[24,128], index: 0, kind: input, shape index: {}]   ;;  %s4089_s3 = inlined_call_operand.vmem [shape: f32[24,128], index: 3, kind: output, shape index: {}]  }
   0x1   :  { %v3210_v0 = vld [vmem:[%s4086_s1 + $0x4] ss:$8 sps:$4 sm:$0xff]   ;;  %160 = vmatprep.mubr.bf16.mxu0 %v3256_v1  ;;  %3207 = vset.pattern.permute.xlu1 %v3257_v2  ;;  %v3212_v3 = vld [vmem:[%s4086_s1] ss:$8 sps:$4 sm:$0xff]   ;;  %v3213_v4 = vld [vmem:[%s4086_s1 + $0x14] ss:$8 sps:$4 sm:$0xff]  }
   0x2   :  { %3206 = vset.pattern.permute.xlu0 %v3257_v2  ;;  %128 = vmatprep.subr.bf16.mxu0 %v3210_v0  ;;  %v3215_v5 = vld [vmem:[%s4086_s1 + $0x10] ss:$8 sps:$4 sm:$0xff]   ;;  %v3216_v6 = vld [vmem:[%s4086_s1 + $0x24] ss:$8 sps:$4 sm:$0xff]   ;;  %v3218_v7 = vld [vmem:[%s4086_s1 + $0x20] ss:$8 sps:$4 sm:$0xff]  }
   0x3   :  { %129 = vmatpush1.bf16.msra.mxu0 %v3212_v3  ;;  %v3219_v8 = vld [vmem:[%s4086_s1 + $0x34] ss:$8 sps:$4 sm:$0xff]   ;;  %v3221_v9 = vld [vmem:[%s4086_s1 + $0x30] ss:$8 sps:$4 sm:$0xff]   ;;  %v211_v10 = vld [vmem:[%s4087_s2 + $0xa0] sm:$0xff]  ;;  %v3352_v28 = vshrl.u32 %v38_v27, 7 }
   0x4   :  { %130 = vmatprep.subr.bf16.mxu0 %v3213_v4  ;;  %v3222_v11 = vld [vmem:[%s4086_s1 + $0x44] ss:$8 sps:$4 sm:$0xff]   ;;  %239 = vperm.xlu1 %3207, %v211_v10   ;;  %v3224_v13 = vld [vmem:[%s4086_s1 + $0x40] ss:$8 sps:$4 sm:$0xff]   ;;  %v3225_v14 = vld [vmem:[%s4086_s1 + $0x54] ss:$8 sps:$4 sm:$0xff]  }
   0x5   :  { %v209_v12 = vld [vmem:[%s4087_s2 + $0x80] sm:$0xff]  ;;  %v210_v15 = vld [vmem:[%s4087_s2 + $0x90] sm:$0xff]  ;;  %v16_v23 = vld [vmem:[%s4088_s0 + $0x8] sm:$0xff]  ;;  %v3355_v29 = vsub.s32 0, %v3352_v28  ;;  %v3361_v31 = vsub.s32 1, %v3352_v28  ;;  %vm220_vm0 = vcmp.lt.s32.totalorder %v3352_v28, 1 }
   0x6   :  { %229 = vperm.xlu0 %3206, %v209_v12   ;;  %v3227_v17 = vld [vmem:[%s4086_s1 + $0x50] ss:$8 sps:$4 sm:$0xff]   ;;  %v3228_v18 = vld [vmem:[%s4086_s1 + $0x64] ss:$8 sps:$4 sm:$0xff]   ;;  %v3230_v19 = vld [vmem:[%s4086_s1 + $0x60] ss:$8 sps:$4 sm:$0xff]  }
   0x7   :  { %131 = vmatpush1.bf16.msra.mxu0 %v3215_v5  ;;  %v3231_v20 = vld [vmem:[%s4086_s1 + $0x74] ss:$8 sps:$4 sm:$0xff]   ;;  %v3233_v21 = vld [vmem:[%s4086_s1 + $0x70] ss:$8 sps:$4 sm:$0xff]   ;;  %v15_v22 = vld [vmem:[%s4088_s0] sm:$0xff]  ;;  %vm254_vm1 = vcmp.lt.s32.totalorder %v3352_v28, 7 }
   0x8   :  { %132 = vmatprep.subr.bf16.mxu0 %v3216_v6  ;;  %3208 = vset.pattern.permute.xlu1 %v3258_v16  ;;  %v18_v24 = vpack.c.bf16 %v16_v23, %v15_v22  ;;  %v17_v25 = vld [vmem:[%s4088_s0 + $0x10] sm:$0xff]  ;;  %v36_v30 = vld [vmem:[%s4087_s2] ss:$8 sm:$0x3]  ;;  %vm595_vm4 = vcmask 195584   ;;  %s3262_s18 = smov 64  }
   0x9   :  { %262 = vperm.xlu1 %3208, %v209_v12   ;;  %v19_v26 = vpack.c.bf16 %v17_v25, %v17_v25  ;;  %v41_v32 = vrot.slane %v36_v30, %v3355_v29  ;;  %v45_v33 = vrot.slane %v36_v30, %v3361_v31  ;;  %vm3264_vm5 = vmmov 0  }
   0xa   :  { %234 = vperm.xlu0 %3206, %v210_v15   ;;  %vm1128_vm6 = vcmask 261120   ;;  %vm1633_vm7 = vcmask 64512   ;;  %vm2110_vm8 = vcmask 15360   ;;  %vm2117_vm9 = vcmask 1041408  }
   0xb   :  { %133 = vmatpush1.bf16.msra.mxu0 %v3218_v7 }
   0xc   :  { %134 = vmatprep.subr.bf16.mxu0 %v3219_v8 }
   0xd   :  { %270 = vperm.xlu1 %3208, %v211_v10  }
   0xe   :  { %3209 = vset.pattern.permute.xlu0 %v3258_v16 }
   0xf   :  { %135 = vmatpush1.bf16.msra.mxu0 %v3221_v9  ;;  %266 = vperm.xlu0 %3209, %v210_v15  }
  0x10   :  { %136 = vmatprep.subr.bf16.mxu0 %v3222_v11 }
  0x13   :  { %137 = vmatpush1.bf16.msra.mxu0 %v3224_v13 }
  0x14   :  { %138 = vmatprep.subr.bf16.mxu0 %v3225_v14 }
  0x17   :  { %139 = vmatpush1.bf16.msra.mxu0 %v3227_v17 }
  0x18   :  { %140 = vmatprep.subr.bf16.mxu0 %v3228_v18 }
  0x1b   :  { %141 = vmatpush1.bf16.msra.mxu0 %v3230_v19 }
  0x1c   :  { %142 = vmatprep.subr.bf16.mxu0 %v3231_v20 }
  0x1f   :  { %143 = vmatpush1.bf16.msra.mxu0 %v3233_v21 }
  0x22   :  { %161 = vmatmul.mubr.bf16.vlgmr.msra.gmra.mrb[0].mxu0 %v18_v24 }
  0x23   :  { %170 = vmatprep.mubr.bf16.mxu0 %v3256_v1 }
  0x2a   :  { %171 = vmatmul.mubr.bf16.gmra.mrb[4].mxu0 %v19_v26 }
  0x83   :  { %v240_v22 = vpop.permute.xlu1 %239 }
  0x85   :  { %v230_v30 = vpop.permute.xlu0 %229 }
  0xf5   :  { %v162_v34 = vpop.f32.mrb[0].mxu0 }
  0xf6   :  { %v163_v35 = vadd.f32 %v162_v34, %v41_v32  ;;  %v164_v36 = vpop.f32.mrb[1].mxu0 }
  0xf7   :  { %v165_v37 = vadd.f32 %v164_v36, %v45_v33  ;;  %v166_v38 = vpop.f32.mrb[2].mxu0 }
  0xf8   :  { %v179_v39 = vadd.f32 3.0, %v163_v35  ;;  %v167_v40 = vadd.f32 %v166_v38, %v41_v32  ;;  %v168_v41 = vpop.f32.mrb[3].mxu0 }
  0xf9   :  { %v180_v42 = vadd.f32 3.0, %v165_v37  ;;  %v169_v43 = vadd.f32 %v168_v41, %v45_v33 }
  0xfa   :  { %v185_v44 = vmax.f32 %v179_v39, 0.0  ;;  %v181_v45 = vadd.f32 3.0, %v167_v40 }
  0xfb   :  { %v186_v46 = vmax.f32 %v180_v42, 0.0  ;;  %v182_v47 = vadd.f32 3.0, %v169_v43 }
  0xfc   :  { %v191_v48 = vmin.f32 %v185_v44, 6.0  ;;  %v187_v49 = vmax.f32 %v181_v45, 0.0 }
  0xfd   :  { %v192_v50 = vmin.f32 %v186_v46, 6.0  ;;  %v188_v51 = vmax.f32 %v182_v47, 0.0  ;;  %v172_v52 = vpop.f32.mrb[4].mxu0 }
  0xfe   :  { %v197_v53 = vmul.f32 %v191_v48, %v163_v35  ;;  %v193_v54 = vmin.f32 %v187_v49, 6.0  ;;  %v173_v55 = vadd.f32 %v172_v52, %v41_v32  ;;  %v174_v56 = vpop.f32.mrb[5].mxu0 }
  0xff   :  { %v198_v57 = vmul.f32 %v192_v50, %v165_v37  ;;  %v194_v58 = vmin.f32 %v188_v51, 6.0  ;;  %v175_v59 = vadd.f32 %v174_v56, %v45_v33  ;;  %v176_v60 = vpop.f32.mrb[6].mxu0 }
 0x100   :  { %v3365_v61 = vmul.f32 0.16666667, %v197_v53  ;;  %v199_v62 = vmul.f32 %v193_v54, %v167_v40  ;;  %v183_v63 = vadd.f32 3.0, %v173_v55  ;;  %v177_v0 = vpop.f32.mrb[7].mxu0  ;;  %v263_v40 = vpop.permute.xlu1 %262  ;;  %v4090_v60 = vmov 0.0  }
 0x101   :  { %v3367_v1 = vmul.f32 0.16666667, %v198_v57  ;;  %v200_v2 = vmul.f32 %v194_v58, %v169_v43  ;;  %v184_v3 = vadd.f32 3.0, %v175_v59  ;;  %v235_v43 = vpop.permute.xlu0 %234  ;;  %669 = vmatprep.mubr.f32.mxu1 %v4090_v60  ;;  %1703 = vmatprep.mubr.f32.mxu0 %v4090_v60 }
 0x102   :  { %v3369_v4 = vmul.f32 0.16666667, %v199_v62  ;;  %v189_v5 = vmax.f32 %v183_v63, 0.0  ;;  %383 = vrot.lane.b32.xlu1 %v3365_v61, %s3259_s4  ;;  %v212_v8 = vrot.slane %v3365_v61, 7  ;;  %v248_v9 = vrot.slane %v3365_v61, 1 }
 0x103   :  { %v3375_v6 = vmul.f32 0.16666667, %v200_v2  ;;  %v190_v7 = vmax.f32 %v184_v3, 0.0  ;;  %v213_v12 = vrot.slane %v3367_v1, 7  ;;  %v249_v16 = vrot.slane %v3367_v1, 1 }
 0x104   :  { %v195_v10 = vmin.f32 %v189_v5, 6.0  ;;  %v214_v11 = vrot.slane %v3369_v4, 7  ;;  %385 = vrot.lane.b32.xlu0 %v3369_v4, %s3259_s4  ;;  %v250_v13 = vrot.slane %v3369_v4, 1  ;;  %v271_v57 = vpop.permute.xlu1 %270 }
 0x105   :  { %v196_v14 = vmin.f32 %v190_v7, 6.0  ;;  %v215_v15 = vrot.slane %v3375_v6, 7  ;;  %v251_v17 = vrot.slane %v3375_v6, 1  ;;  %v267_v51 = vpop.permute.xlu0 %266 }
 0x106   :  { %v201_v18 = vmul.f32 %v195_v10, %v173_v55  ;;  %v257_v19 = vsel %vm254_vm1, %v248_v9, %v250_v13  ;;  %v223_v20 = vsel %vm220_vm0, %v212_v8, %v214_v11  ;;  %441 = vrot.lane.b32.xlu1 %v3365_v61, %s3260_s5 }
 0x107   :  { %v202_v21 = vmul.f32 %v196_v14, %v175_v59  ;;  %v258_v23 = vsel %vm254_vm1, %v249_v16, %v251_v17  ;;  %v224_v24 = vsel %vm220_vm0, %v213_v12, %v215_v15  ;;  %v3425_v44 = vmul.f32 %v263_v40, %v257_v19  ;;  %v3535_v14 = vld [vmem:[%s4087_s2 + $0x10] sm:$0xff] }
 0x108   :  { %v3397_v25 = vmul.f32 0.16666667, %v201_v18  ;;  %443 = vrot.lane.b32.xlu0 %v3369_v4, %s3260_s5  ;;  %v3433_v47 = vmul.f32 %v235_v43, %v223_v20  ;;  %v3441_v48 = vmul.f32 %v263_v40, %v258_v23  ;;  %v3445_v49 = vmul.f32 %v235_v43, %v224_v24 }
 0x109   :  { %v3401_v26 = vmul.f32 0.16666667, %v202_v21  ;;  %v365_v18 = vsub.s32 2, %v3352_v28  ;;  %v327_v19 = vrot.slane %v3535_v14, %v3361_v31  ;;  %v403_v21 = vsub.s32 3, %v3352_v28 }
 0x10a   :  { %v216_v32 = vrot.slane %v3397_v25, 7  ;;  %389 = vrot.lane.b32.xlu1 %v3367_v1, %s3259_s4  ;;  %v252_v34 = vrot.slane %v3397_v25, 1 }
 0x10b   :  { %v217_v33 = vrot.slane %v3401_v26, 7  ;;  %v253_v35 = vrot.slane %v3401_v26, 1 }
 0x10c   :  { %v221_v36 = vsel %vm220_vm0, %v214_v11, %v216_v32  ;;  %v225_v37 = vsel %vm220_vm0, %v216_v32, %v212_v8  ;;  %391 = vrot.lane.b32.xlu0 %v3375_v6, %s3259_s4  ;;  %v259_v41 = vsel %vm254_vm1, %v252_v34, %v248_v9  ;;  %v255_v45 = vsel %vm254_vm1, %v250_v13, %v252_v34 }
 0x10d   :  { %v222_v38 = vsel %vm220_vm0, %v215_v15, %v217_v33  ;;  %v226_v39 = vsel %vm220_vm0, %v217_v33, %v213_v12  ;;  %v260_v42 = vsel %vm254_vm1, %v253_v35, %v249_v16  ;;  %v256_v46 = vsel %vm254_vm1, %v251_v17, %v253_v35  ;;  %v3540_v15 = vld [vmem:[%s4087_s2 + $0x18] sm:$0xff] }
 0x10e   :  { %447 = vrot.lane.b32.xlu1 %v3367_v1, %s3260_s5  ;;  %v3449_v50 = vmul.f32 %v230_v30, %v225_v37  ;;  %v3459_v52 = vmul.f32 %v240_v22, %v221_v36  ;;  %v3463_v53 = vmul.f32 %v267_v51, %v255_v45  ;;  %v3471_v54 = vmul.f32 %v230_v30, %v226_v39 }
 0x10f   :  { %v3479_v55 = vmul.f32 %v240_v22, %v222_v38  ;;  %v3489_v56 = vmul.f32 %v267_v51, %v256_v46  ;;  %v3497_v58 = vmul.f32 %v271_v57, %v259_v41  ;;  %v3501_v59 = vmul.f32 %v271_v57, %v260_v42 }
 0x110   :  { %449 = vrot.lane.b32.xlu0 %v3375_v6, %s3260_s5  ;;  %v3530_v12 = vand.u32 127, %v38_v27  ;;  %v3546_v17 = vrot.slane %v3535_v14, %v3355_v29  ;;  %v3550_v27 = vrot.slane %v3540_v15, %v3355_v29  ;;  %v331_v20 = vrot.slane %v3540_v15, %v3361_v31 }
 0x111   :  { %v3568_v34 = vrot.slane %v3535_v14, %v365_v18  ;;  %v3571_v35 = vrot.slane %v3540_v15, %v365_v18  ;;  %v423_v36 = vsub.s32 4, %v3352_v28  ;;  %v334_v37 = vmul.f32 %v327_v19, %v3433_v47 }
 0x112   :  { %479 = vrot.lane.b32.xlu1 %v3425_v44, %s3259_s4  ;;  %vm297_vm2 = vcmp.lt.s32.totalorder %v3530_v12, 32  ;;  %vm356_vm3 = vcmp.lt.s32.totalorder %v3530_v12, 96  ;;  %v335_v38 = vmul.f32 %v331_v20, %v3445_v49  ;;  %v3578_v39 = vrot.slane %v3535_v14, %v403_v21 }
 0x113   :  { %v3581_v40 = vrot.slane %v3540_v15, %v403_v21  ;;  %v519_v18 = vsub.s32 7, %v3352_v28  ;;  %v424_v21 = vrot.slane %v3535_v14, %v423_v36 }
 0x114   :  { %285 = vrot.lane.b32.xlu0 %v3433_v47, %s3259_s4 }
 0x116   :  { %387 = vrot.lane.b32.xlu1 %v3397_v25, %s3259_s4 }
 0x118   :  { %346 = vrot.lane.b32.xlu0 %v3433_v47, %s3260_s5 }
 0x11a   :  { %485 = vrot.lane.b32.xlu1 %v3441_v48, %s3259_s4 }
 0x11c   :  { %291 = vrot.lane.b32.xlu0 %v3445_v49, %s3259_s4 }
 0x11e   :  { %283 = vrot.lane.b32.xlu1 %v3449_v50, %s3259_s4 }
 0x120   :  { %352 = vrot.lane.b32.xlu0 %v3445_v49, %s3260_s5 }
 0x122   :  { %344 = vrot.lane.b32.xlu1 %v3449_v50, %s3260_s5 }
 0x124   :  { %393 = vrot.lane.b32.xlu0 %v3401_v26, %s3259_s4 }
 0x126   :  { %287 = vrot.lane.b32.xlu1 %v3459_v52, %s3259_s4 }
 0x128   :  { %481 = vrot.lane.b32.xlu0 %v3463_v53, %s3259_s4 }
 0x12a   :  { %348 = vrot.lane.b32.xlu1 %v3459_v52, %s3260_s5 }
 0x12c   :  { %451 = vrot.lane.b32.xlu0 %v3401_v26, %s3260_s5 }
 0x12e   :  { %289 = vrot.lane.b32.xlu1 %v3471_v54, %s3259_s4 }
 0x130   :  { %539 = vrot.lane.b32.xlu0 %v3463_v53, %s3260_s5 }
 0x132   :  { %350 = vrot.lane.b32.xlu1 %v3471_v54, %s3260_s5 }
 0x134   :  { %293 = vrot.lane.b32.xlu0 %v3479_v55, %s3259_s4 }
 0x136   :  { %445 = vrot.lane.b32.xlu1 %v3397_v25, %s3260_s5 }
 0x138   :  { %354 = vrot.lane.b32.xlu0 %v3479_v55, %s3260_s5 }
 0x13a   :  { %537 = vrot.lane.b32.xlu1 %v3425_v44, %s3260_s5 }
 0x13c   :  { %487 = vrot.lane.b32.xlu0 %v3489_v56, %s3259_s4 }
 0x13e   :  { %543 = vrot.lane.b32.xlu1 %v3441_v48, %s3260_s5 }
 0x140   :  { %545 = vrot.lane.b32.xlu0 %v3489_v56, %s3260_s5 }
 0x142   :  { %483 = vrot.lane.b32.xlu1 %v3497_v58, %s3259_s4 }
 0x144   :  { %489 = vrot.lane.b32.xlu0 %v3501_v59, %s3259_s4 }
 0x146   :  { %541 = vrot.lane.b32.xlu1 %v3497_v58, %s3260_s5 }
 0x148   :  { %547 = vrot.lane.b32.xlu0 %v3501_v59, %s3260_s5 }
 0x174   :  { %v3513_v62 = vpop.permute.xlu1 %383 }
 0x176   :  { %v386_v63 = vpop.permute.xlu0 %385 }
 0x178   :  { %v3515_v0 = vpop.permute.xlu1 %441 }
 0x17a   :  { %v3517_v2 = vpop.permute.xlu0 %443 }
 0x17c   :  { %v3519_v3 = vpop.permute.xlu1 %389 }
 0x17e   :  { %v392_v5 = vpop.permute.xlu0 %391 }
 0x17f   :  { %v396_v42 = vsel %vm297_vm2, %v386_v63, %v392_v5  ;;  %v399_v43 = vsel %vm297_vm2, %v392_v5, %v386_v63  ;;  %v428_v63 = vrot.slane %v3540_v15, %v423_v36  ;;  %v520_v36 = vrot.slane %v3535_v14, %v519_v18 }
 0x180   :  { %v3521_v7 = vpop.permute.xlu1 %447  ;;  %v411_v5 = vmul.f32 %v3578_v39, %v399_v43  ;;  %v3609_v43 = vrot.slane %v3540_v15, %v519_v18 }
 0x181   :  { %v3630_v18 = vmul.f32 %v520_v36, %v3425_v44 }
 0x182   :  { %v3523_v8 = vpop.permute.xlu0 %449 }
 0x184   :  { %v3525_v9 = vpop.permute.xlu1 %479 }
 0x186   :  { %v286_v10 = vpop.permute.xlu0 %285 }
 0x188   :  { %v3527_v11 = vpop.permute.xlu1 %387 }
 0x18a   :  { %v347_v13 = vpop.permute.xlu0 %346 }
 0x18c   :  { %v3542_v16 = vpop.permute.xlu1 %485 }
 0x18e   :  { %v292_v22 = vpop.permute.xlu0 %291 }
 0x18f   :  { %v299_v23 = vsel %vm297_vm2, %v286_v10, %v292_v22  ;;  %v302_v24 = vsel %vm297_vm2, %v292_v22, %v286_v10  ;;  %v412_v22 = vmul.f32 %v3581_v40, %v396_v42 }
 0x190   :  { %v314_v30 = vmul.f32 %v3546_v17, %v302_v24  ;;  %v315_v32 = vmul.f32 %v3550_v27, %v299_v23  ;;  %v3565_v33 = vpop.permute.xlu1 %283 }
 0x192   :  { %v353_v41 = vpop.permute.xlu0 %352  ;;  %v340_v47 = vadd.f32 %v334_v37, %v314_v30  ;;  %v341_v49 = vadd.f32 %v335_v38, %v315_v32  ;;  %v461_v30 = vsub.s32 5, %v3352_v28 }
 0x193   :  { %v358_v45 = vsel %vm356_vm3, %v347_v13, %v353_v41  ;;  %v361_v46 = vsel %vm356_vm3, %v353_v41, %v347_v13  ;;  %v431_v41 = vmul.f32 %v424_v21, %v3369_v4 }
 0x194   :  { %v373_v51 = vmul.f32 %v3568_v34, %v358_v45  ;;  %v374_v57 = vmul.f32 %v3571_v35, %v361_v46  ;;  %v3593_v10 = vpop.permute.xlu1 %344  ;;  %v432_v45 = vmul.f32 %v428_v63, %v3375_v6  ;;  %v3622_v4 = vrot.slane %v3540_v15, %v461_v30 }
 0x196   :  { %v379_v23 = vadd.f32 %v373_v51, %v340_v47  ;;  %v380_v13 = vadd.f32 %v374_v57, %v341_v49  ;;  %v3600_v24 = vpop.permute.xlu0 %393  ;;  %v499_v49 = vsub.s32 6, %v3352_v28  ;;  %v3619_v51 = vrot.slane %v3535_v14, %v461_v30 }
 0x197   :  { %v3627_v57 = vmul.f32 %v424_v21, %v3365_v61  ;;  %v3637_v28 = vmul.f32 %v428_v63, %v3367_v1  ;;  %v337_v61 = vmul.f32 %v331_v20, %v3479_v55  ;;  %v3648_v30 = vmul.f32 %v424_v21, %v3397_v25 }
 0x198   :  { %v417_v32 = vadd.f32 %v411_v5, %v379_v23  ;;  %v418_v37 = vadd.f32 %v412_v22, %v380_v13  ;;  %v3603_v38 = vpop.permute.xlu1 %287  ;;  %v3634_v5 = vmul.f32 %v3609_v43, %v3441_v48  ;;  %v594_v22 = vld [vmem:[%s4087_s2 + $0xb0] sm:$0x3]  ;;  %v336_v23 = vmul.f32 %v327_v19, %v3459_v52 }
 0x199   :  { %v332_v13 = vmul.f32 %v327_v19, %v3449_v50  ;;  %v333_v48 = vmul.f32 %v331_v20, %v3471_v54  ;;  %v3652_v1 = vmul.f32 %v520_v36, %v3497_v58  ;;  %v2932_v50 = vld [vmem:[%s4087_s2 + $0x1] ss:$8 sm:$0x3]  ;;  %v3664_v52 = vmul.f32 %v520_v36, %v3463_v53 }
 0x19a   :  { %v3611_v42 = vpop.permute.xlu0 %481  ;;  %v3613_v46 = vadd.f32 %v432_v45, %v418_v37  ;;  %v3615_v47 = vadd.f32 %v431_v41, %v417_v32  ;;  %v3655_v32 = vrot.slane %v3535_v14, %v499_v49  ;;  %v3658_v37 = vrot.slane %v3540_v15, %v499_v49 }
 0x19b   :  { %v395_v25 = vsel %vm297_vm2, %v3513_v62, %v3519_v3  ;;  %v398_v54 = vsel %vm297_vm2, %v3519_v3, %v3513_v62  ;;  %v3674_v58 = vsel %vm595_vm4, %v594_v22, 0  ;;  %v3678_v14 = vmul.f32 %v3609_v43, %v3489_v56 }
 0x19c   :  { %v3624_v6 = vpop.permute.xlu1 %348  ;;  %v453_v53 = vsel %vm356_vm3, %v3515_v0, %v3521_v7  ;;  %v3695_v56 = vrot.slane %v2932_v50, %v3355_v29  ;;  %v3698_v21 = vmul.f32 %v428_v63, %v3401_v26  ;;  %v409_v41 = vmul.f32 %v3578_v39, %v398_v54 }
 0x19d   :  { %v410_v45 = vmul.f32 %v3581_v40, %v395_v25  ;;  %v3703_v36 = vrot.slane %v2932_v50, %v3361_v31  ;;  %v456_v49 = vsel %vm356_vm3, %v3521_v7, %v3515_v0  ;;  %v467_v22 = vmul.f32 %v3619_v51, %v453_v53 }
 0x19e   :  { %v3645_v44 = vpop.permute.xlu0 %451  ;;  %v454_v26 = vsel %vm356_vm3, %v3517_v2, %v3523_v8  ;;  %v457_v63 = vsel %vm356_vm3, %v3523_v8, %v3517_v2  ;;  %v491_v25 = vsel %vm297_vm2, %v3525_v9, %v3542_v16  ;;  %v494_v0 = vsel %vm297_vm2, %v3542_v16, %v3525_v9 }
 0x19f   :  { %v469_v60 = vmul.f32 %v3619_v51, %v454_v26  ;;  %v506_v26 = vmul.f32 %v3658_v37, %v491_v25 }
 0x1a0   :  { %v290_v55 = vpop.permute.xlu1 %289 }
 0x1a1   :  { %v298_v15 = vsel %vm297_vm2, %v3565_v33, %v290_v55  ;;  %v301_v62 = vsel %vm297_vm2, %v290_v55, %v3565_v33  ;;  %v3706_v33 = vand.u32 4294901760, %v3674_v58 }
 0x1a2   :  { %v312_v3 = vmul.f32 %v3546_v17, %v301_v62  ;;  %v313_v19 = vmul.f32 %v3550_v27, %v298_v15  ;;  %v3692_v20 = vpop.permute.xlu0 %539  ;;  %v468_v62 = vmul.f32 %v3622_v4, %v456_v49  ;;  %v505_v49 = vmul.f32 %v3655_v32, %v494_v0 }
 0x1a4   :  { %v351_v50 = vpop.permute.xlu1 %350  ;;  %v338_v2 = vadd.f32 %v332_v13, %v312_v3  ;;  %v339_v8 = vadd.f32 %v333_v48, %v313_v19 }
 0x1a5   :  { %v357_v7 = vsel %vm356_vm3, %v3593_v10, %v351_v50  ;;  %v360_v54 = vsel %vm356_vm3, %v351_v50, %v3593_v10  ;;  %v470_v50 = vmul.f32 %v3622_v4, %v457_v63 }
 0x1a6   :  { %v371_v55 = vmul.f32 %v3568_v34, %v357_v7  ;;  %v372_v53 = vmul.f32 %v3571_v35, %v360_v54  ;;  %v294_v15 = vpop.permute.xlu0 %293  ;;  %v397_v7 = vsel %vm297_vm2, %v3527_v11, %v3600_v24 }
 0x1a7   :  { %v300_v9 = vsel %vm297_vm2, %v3603_v38, %v294_v15  ;;  %v303_v16 = vsel %vm297_vm2, %v294_v15, %v3603_v38  ;;  %v400_v38 = vsel %vm297_vm2, %v3600_v24, %v3527_v11  ;;  %v475_v15 = vadd.f32 %v469_v60, %v3615_v47  ;;  %v2930_v60 = vld [vmem:[%s4087_s2 + $0x20] ss:$0 sm:$0xff] }
 0x1a8   :  { %v377_v10 = vadd.f32 %v371_v55, %v338_v2  ;;  %v378_v13 = vadd.f32 %v372_v53, %v339_v8  ;;  %v316_v48 = vmul.f32 %v3546_v17, %v303_v16  ;;  %v317_v3 = vmul.f32 %v3550_v27, %v300_v9  ;;  %v446_v19 = vpop.permute.xlu1 %445 }
 0x1a9   :  { %v455_v27 = vsel %vm356_vm3, %v446_v19, %v3645_v44  ;;  %v476_v53 = vadd.f32 %v470_v50, %v3613_v46  ;;  %v2931_v46 = vld [vmem:[%s4087_s2 + $0x28] ss:$0 sm:$0xff] }
 0x1aa   :  { %v415_v17 = vadd.f32 %v409_v41, %v377_v10  ;;  %v416_v54 = vadd.f32 %v410_v45, %v378_v13  ;;  %v355_v63 = vpop.permute.xlu0 %354  ;;  %v342_v0 = vadd.f32 %v336_v23, %v316_v48  ;;  %v343_v2 = vadd.f32 %v337_v61, %v317_v3 }
 0x1ab   :  { %v359_v25 = vsel %vm356_vm3, %v3624_v6, %v355_v63  ;;  %v362_v8 = vsel %vm356_vm3, %v355_v63, %v3624_v6  ;;  %v413_v23 = vmul.f32 %v3578_v39, %v400_v38  ;;  %v414_v61 = vmul.f32 %v3581_v40, %v397_v7 }
 0x1ac   :  { %v435_v55 = vadd.f32 %v3627_v57, %v415_v17  ;;  %v436_v11 = vadd.f32 %v3637_v28, %v416_v54  ;;  %v375_v24 = vmul.f32 %v3568_v34, %v359_v25  ;;  %v376_v41 = vmul.f32 %v3571_v35, %v362_v8  ;;  %v538_v45 = vpop.permute.xlu1 %537 }
 0x1ad   :  { %v458_v34 = vsel %vm356_vm3, %v3645_v44, %v446_v19  ;;  %v471_v35 = vmul.f32 %v3619_v51, %v455_v27 }
 0x1ae   :  { %v381_v9 = vadd.f32 %v375_v24, %v342_v0  ;;  %v382_v16 = vadd.f32 %v376_v41, %v343_v2  ;;  %v488_v6 = vpop.permute.xlu0 %487  ;;  %v474_v10 = vadd.f32 %v468_v62, %v436_v11  ;;  %v473_v57 = vadd.f32 %v467_v22, %v435_v55 }
 0x1af   :  { %v492_v39 = vsel %vm297_vm2, %v3611_v42, %v488_v6  ;;  %v495_v40 = vsel %vm297_vm2, %v488_v6, %v3611_v42  ;;  %v530_v11 = vmul.f32 %v3609_v43, %v3501_v59 }
 0x1b0   :  { %v419_v47 = vadd.f32 %v413_v23, %v381_v9  ;;  %v420_v28 = vadd.f32 %v414_v61, %v382_v16  ;;  %v507_v51 = vmul.f32 %v3655_v32, %v495_v40  ;;  %v508_v44 = vmul.f32 %v3658_v37, %v492_v39  ;;  %v544_v22 = vpop.permute.xlu1 %543 }
 0x1b1   :  { %v512_v62 = vadd.f32 %v506_v26, %v474_v10  ;;  %v511_v13 = vadd.f32 %v505_v49, %v473_v57  ;;  %v549_v42 = vsel %vm356_vm3, %v538_v45, %v544_v22  ;;  %v552_v48 = vsel %vm356_vm3, %v544_v22, %v538_v45 }
 0x1b2   :  { %v513_v3 = vadd.f32 %v507_v51, %v475_v15  ;;  %v514_v19 = vadd.f32 %v508_v44, %v476_v53  ;;  %v563_v50 = vmul.f32 %v2930_v60, %v549_v42  ;;  %v564_v7 = vmul.f32 %v2931_v46, %v552_v48  ;;  %v546_v38 = vpop.permute.xlu0 %545 }
 0x1b3   :  { %v532_v17 = vadd.f32 %v3634_v5, %v512_v62  ;;  %v531_v54 = vadd.f32 %v3630_v18, %v511_v13  ;;  %v550_v26 = vsel %vm356_vm3, %v3692_v20, %v546_v38  ;;  %v553_v49 = vsel %vm356_vm3, %v546_v38, %v3692_v20 }
 0x1b4   :  { %v534_v27 = vadd.f32 %v3678_v14, %v514_v19  ;;  %v533_v63 = vadd.f32 %v3664_v52, %v513_v3  ;;  %v565_v0 = vmul.f32 %v2930_v60, %v550_v26  ;;  %v566_v2 = vmul.f32 %v2931_v46, %v553_v49  ;;  %v484_v25 = vpop.permute.xlu1 %483 }
 0x1b5   :  { %v569_v8 = vadd.f32 %v563_v50, %v531_v54  ;;  %v570_v55 = vadd.f32 %v564_v7, %v532_v17  ;;  %v439_v5 = vadd.f32 %v3648_v30, %v419_v47  ;;  %v440_v18 = vadd.f32 %v3698_v21, %v420_v28 }
 0x1b6   :  { %v571_v24 = vadd.f32 %v565_v0, %v533_v63  ;;  %v572_v41 = vadd.f32 %v566_v2, %v534_v27  ;;  %v490_v45 = vpop.permute.xlu0 %489  ;;  %v3813_v14 = vsub.f32 %v3674_v58, %v3706_v33  ;;  %v472_v52 = vmul.f32 %v3622_v4, %v458_v34 }
 0x1b7   :  { %v3817_v20 = vadd.f32 %v3695_v56, %v569_v8  ;;  %v3820_v23 = vadd.f32 %v3703_v36, %v570_v55  ;;  %v477_v30 = vadd.f32 %v471_v35, %v439_v5  ;;  %v493_v43 = vsel %vm297_vm2, %v484_v25, %v490_v45 }
 0x1b8   :  { %v3823_v21 = vadd.f32 %v3695_v56, %v571_v24  ;;  %v3826_v59 = vadd.f32 %v3703_v36, %v572_v41  ;;  %v496_v58 = vsel %vm297_vm2, %v490_v45, %v484_v25  ;;  %v478_v4 = vadd.f32 %v472_v52, %v440_v18  ;;  %v542_v9 = vpop.permute.xlu1 %541 }
 0x1b9   :  { %v509_v61 = vmul.f32 %v3655_v32, %v496_v58  ;;  %v510_v53 = vmul.f32 %v3658_v37, %v493_v43  ;;  %v599_v15 = vand.u32 4294901760, %v3820_v23  ;;  %v601_v10 = vand.u32 4294901760, %v3817_v20 }
 0x1ba   :  { %v548_v16 = vpop.permute.xlu0 %547  ;;  %v603_v6 = vand.u32 4294901760, %v3826_v59  ;;  %v605_v57 = vand.u32 4294901760, %v3823_v21  ;;  %v672_v34 = vand.u32 4294901760, %v3813_v14  ;;  %v4092_v41 = vmov 0.0  }
 0x1bb   :  { %v515_v35 = vadd.f32 %v509_v61, %v477_v30  ;;  %v516_v39 = vadd.f32 %v510_v53, %v478_v4  ;;  %v551_v40 = vsel %vm356_vm3, %v542_v9, %v548_v16  ;;  %v554_v32 = vsel %vm356_vm3, %v548_v16, %v542_v9  ;;  %v1123_v16 = vld [vmem:[%s4087_s2 + $0x30] sm:$0xff] }
 0x1bc   :  { %v567_v37 = vmul.f32 %v2930_v60, %v551_v40  ;;  %v568_v47 = vmul.f32 %v2931_v46, %v554_v32  ;;  %v3843_v28 = vpack.c.bf16 %v603_v6, %v599_v15  ;;  %v682_v51 = vsub.f32 %v3820_v23, %v599_v15 }
 0x1bd   :  { %v535_v44 = vadd.f32 %v3652_v1, %v515_v35  ;;  %v536_v22 = vadd.f32 %v530_v11, %v516_v39  ;;  %v694_v62 = vsub.f32 %v3826_v59, %v603_v6  ;;  %v3848_v13 = vpack.c.bf16 %v605_v57, %v601_v10  ;;  %v1124_v6 = vld [vmem:[%s4087_s2 + $0x40] sm:$0xff] }
 0x1be   :  { %3075 = vmatprep.subr.bf16.mxu1 %v3843_v28  ;;  %v688_v42 = vsub.f32 %v3817_v20, %v601_v10  ;;  %v700_v12 = vsub.f32 %v3823_v21, %v605_v57  ;;  %v673_v60 = vsub.f32 %v3813_v14, %v672_v34  ;;  %v683_v46 = vand.u32 4294901760, %v682_v51  ;;  %v1125_v10 = vld [vmem:[%s4087_s2 + $0x50] sm:$0xff]  ;;  %v1126_v35 = vld [vmem:[%s4087_s2 + $0x60] sm:$0xff] }
 0x1bf   :  { %v573_v48 = vadd.f32 %v567_v37, %v535_v44  ;;  %v574_v3 = vadd.f32 %v568_v47, %v536_v22  ;;  %3077 = vmatpush1.bf16.msra.mxu1 %v3848_v13  ;;  %v695_v1 = vand.u32 4294901760, %v694_v62  ;;  %v3082_v58 = vpack.c.bf16 %v694_v62, %v682_v51 }
 0x1c0   :  { %v684_v19 = vsub.f32 %v682_v51, %v683_v46  ;;  %v689_v50 = vand.u32 4294901760, %v688_v42  ;;  %v701_v7 = vand.u32 4294901760, %v700_v12  ;;  %v674_v26 = vand.u32 4294901760, %v673_v60 }
 0x1c1   :  { %v3858_v38 = vadd.f32 %v3695_v56, %v573_v48  ;;  %v3861_v17 = vadd.f32 %v3703_v36, %v574_v3  ;;  %v696_v54 = vsub.f32 %v694_v62, %v695_v1  ;;  %v3084_v4 = vpack.c.bf16 %v700_v12, %v688_v42 }
 0x1c2   :  { %v690_v49 = vsub.f32 %v688_v42, %v689_v50  ;;  %v702_v27 = vsub.f32 %v700_v12, %v701_v7  ;;  %v685_v2 = vand.u32 4294901760, %v684_v19  ;;  %v3090_v61 = vpack.c.bf16 %v695_v1, %v683_v46 }
 0x1c3   :  { %v607_v63 = vand.u32 4294901760, %v3861_v17  ;;  %v609_v0 = vand.u32 4294901760, %v3858_v38  ;;  %v697_v25 = vand.u32 4294901760, %v696_v54  ;;  %v3092_v53 = vpack.c.bf16 %v701_v7, %v689_v50 }
 0x1c4   :  { %v691_v8 = vand.u32 4294901760, %v690_v49  ;;  %v703_v55 = vand.u32 4294901760, %v702_v27  ;;  %v3263_v57 = vmov 0.0|0.0   ;;  %v1139_v39 = vand.u32 4294901760, %v1125_v10 }
 0x1c5   :  { %608 = vmatprep.subr.mxu1 %v607_v63  ;;  %v3078_v5 = vpack.c.bf16 %v697_v25, %v685_v2  ;;  %v706_v56 = vsub.f32 %v3861_v17, %v607_v63  ;;  %v712_v18 = vsub.f32 %v3858_v38, %v609_v0  ;;  %v1142_v40 = vand.u32 4294901760, %v1126_v35 }
 0x1c6   :  { %610 = vmatpush1.msra.mxu1 %v609_v0  ;;  %v3080_v36 = vpack.c.bf16 %v703_v55, %v691_v8  ;;  %v1227_v51 = vsub.f32 %v1125_v10, %v1139_v39 }
 0x1c7   :  { %675 = vmatmul.mubr.f32.vlgmr.msra.gmra.mrb[0].mxu1 %v674_v26  ;;  %3079 = vmatprep.subr.bf16.mxu1 %v3078_v5  ;;  %v707_v11 = vand.u32 4294901760, %v706_v56  ;;  %v713_v24 = vand.u32 4294901760, %v712_v18  ;;  %v1234_v22 = vsub.f32 %v1126_v35, %v1142_v40  ;;  %v3102_v62 = vpack.c.bf16 %v1142_v40, %v1139_v39 }
 0x1c8   :  { %3081 = vmatpush1.bf16.msra.mxu1 %v3080_v36  ;;  %775 = vmatprep.mubr.f32.mxu1 %v4092_v41  ;;  %v1228_v46 = vand.u32 4294901760, %v1227_v51 }
 0x1c9   :  { %v708_v45 = vsub.f32 %v706_v56, %v707_v11  ;;  %v714_v52 = vsub.f32 %v712_v18, %v713_v24  ;;  %v1235_v48 = vand.u32 4294901760, %v1234_v22 }
 0x1ca   :  { %v1229_v19 = vsub.f32 %v1227_v51, %v1228_v46 }
 0x1cb   :  { %v709_v30 = vand.u32 4294901760, %v708_v45  ;;  %v715_v43 = vand.u32 4294901760, %v714_v52  ;;  %v1236_v50 = vsub.f32 %v1234_v22, %v1235_v48  ;;  %v3126_v2 = vpack.c.bf16 %v1235_v48, %v1228_v46  ;;  %v1618_v45 = vld [vmem:[%s4087_s2 + $0x70] sm:$0xff] }
 0x1cc   :  { %v1230_v54 = vand.u32 4294901760, %v1229_v19  ;;  %v3251_v48 = vld [vmem:[%s4087_s2 + $0x90] sm:$0xff] }
 0x1cd   :  { %710 = vmatprep.subr.mxu1 %v709_v30  ;;  %v1237_v26 = vand.u32 4294901760, %v1236_v50  ;;  %v1639_v30 = vand.u32 4294901760, %v1618_v45 }
 0x1ce   :  { %716 = vmatpush1.msra.mxu1 %v715_v43 }
 0x1cf   :  { %777 = vmatmul.mubr.f32.vlgmr.msra.gmra.mrb[0].mxu1 %v3706_v33  ;;  %3083 = vmatprep.subr.bf16.mxu1 %v3082_v58  ;;  %v3108_v49 = vpack.c.bf16 %v1237_v26, %v1230_v54 }
 0x1d0   :  { %3085 = vmatpush1.bf16.msra.mxu1 %v3084_v4  ;;  %859 = vmatprep.mubr.f32.mxu1 %v4092_v41 }
 0x1d1   :  { %797 = vmatprep.subr.mxu1 %v706_v56 }
 0x1d4   :  { %800 = vmatpush1.msra.mxu1 %v712_v18 }
 0x1d5   :  { %3087 = vmatprep.subr.bf16.mxu1 %v3843_v28 }
 0x1d7   :  { %862 = vmatmul.mubr.f32.vlgmr.msra.gmra.mrb[0].mxu1 %v3813_v14 }
 0x1d8   :  { %3089 = vmatpush1.bf16.msra.mxu1 %v3848_v13  ;;  %938 = vmatprep.mubr.f32.mxu1 %v4092_v41 }
 0x1d9   :  { %877 = vmatprep.subr.mxu1 %v607_v63 }
 0x1dc   :  { %879 = vmatpush1.msra.mxu1 %v609_v0 }
 0x1dd   :  { %3091 = vmatprep.subr.bf16.mxu1 %v3090_v61 }
 0x1df   :  { %942 = vmatmul.mubr.f32.vlgmr.msra.gmra.mrb[0].mxu1 %v672_v34  ;;  %v1136_v34 = vand.u32 4294901760, %v1124_v6 }
 0x1e0   :  { %3093 = vmatpush1.bf16.msra.mxu1 %v3092_v53  ;;  %1030 = vmatprep.mubr.f32.mxu1 %v4092_v41  ;;  %v1127_v53 = vld [vmem:[%s4087_s2 + $0x2] ss:$0 sm:$0xff] }
 0x1e1   :  { %967 = vmatprep.subr.mxu1 %v707_v11 }
 0x1e4   :  { %971 = vmatpush1.msra.mxu1 %v713_v24  ;;  %v1619_v24 = vld [vmem:[%s4087_s2 + $0x78] sm:$0xff] }
 0x1e5   :  { %3095 = vmatprep.subr.bf16.mxu1 %v3843_v28  ;;  %v1220_v28 = vsub.f32 %v1124_v6, %v1136_v34  ;;  %v1637_v52 = vand.u32 4294901760, %v1619_v24 }
 0x1e7   :  { %1032 = vmatmul.mubr.f32.vlgmr.msra.gmra.mrb[0].mxu1 %v3706_v33  ;;  %v1221_v42 = vand.u32 4294901760, %v1220_v28  ;;  %1638 = vmatprep.subr.mxu0 %v1637_v52  ;;  %v1716_v43 = vsub.f32 %v1619_v24, %v1637_v52 }
 0x1e8   :  { %3097 = vmatpush1.bf16.msra.mxu1 %v3848_v13  ;;  %1108 = vmatprep.mubr.f32.mxu1 %v4092_v41 }
 0x1e9   :  { %1047 = vmatprep.subr.mxu1 %v607_v63  ;;  %v1222_v60 = vsub.f32 %v1220_v28, %v1221_v42  ;;  %v3114_v63 = vpack.c.bf16 %v1234_v22, %v1227_v51  ;;  %1640 = vmatpush1.msra.mxu0 %v1639_v30  ;;  %v1717_v58 = vand.u32 4294901760, %v1716_v43 }
 0x1eb   :  { %v1223_v1 = vand.u32 4294901760, %v1222_v60  ;;  %v1718_v4 = vsub.f32 %v1716_v43, %v1717_v58 }
 0x1ec   :  { %1049 = vmatpush1.msra.mxu1 %v609_v0 }
 0x1ed   :  { %3098 = vmatprep.subr.bf16.mxu1 %v3263_v57  ;;  %v1719_v61 = vand.u32 4294901760, %v1718_v4  ;;  %v3236_v4 = vld [vmem:[%s4086_s1 + $0x110] ss:$8 sps:$4 sm:$0xff]  }
 0x1ef   :  { %1110 = vmatmul.mubr.f32.vlgmr.msra.gmra.mrb[0].mxu1 %v3706_v33  ;;  %v1133_v33 = vand.u32 4294901760, %v1123_v16  ;;  %1720 = vmatprep.subr.mxu0 %v1719_v61 }
 0x1f0   :  { %3016 = vmatprep.mubr.msk.f32.mxu1 %vm3264_vm5, %v4092_v41 }
 0x1f1   :  { %v3897_v37 = vpack.c.bf16 %v1136_v34, %v1133_v33  ;;  %v1213_v47 = vsub.f32 %v1123_v16, %v1133_v33  ;;  %v1722_v16 = vsub.f32 %v1618_v45, %v1639_v30  ;;  %v3234_v45 = vld [vmem:[%s4086_s1 + $0x100] ss:$8 sps:$4 sm:$0xff]  }
 0x1f3   :  { %3100 = vmatpush3.bf16.msra.mxu1 %v3897_v37  ;;  %v1214_v13 = vand.u32 4294901760, %v1213_v47  ;;  %v3111_v27 = vpack.c.bf16 %v1220_v28, %v1213_v47 }
 0x1f4   :  { %3101 = vmatprep.subr.bf16.mxu1 %v3263_v57 }
 0x1f5   :  { %v1215_v12 = vsub.f32 %v1213_v47, %v1214_v13  ;;  %v3123_v0 = vpack.c.bf16 %v1221_v42, %v1214_v13  ;;  %v2933_v47 = vld [vmem:[%s4087_s2 + $0x3] ss:$8 sm:$0x3] }
 0x1f6   :  { %v1626_v28 = vrot.slane %v2933_v47, %v3355_v29  ;;  %v1630_v51 = vrot.slane %v2933_v47, %v3361_v31  ;;  %v2113_v29 = vsel %vm2110_vm8, %v3251_v48, 0  ;;  %v3244_v47 = vld [vmem:[%s4086_s1 + $0x150] ss:$8 sps:$4 sm:$0xff]  }
 0x1f7   :  { %3103 = vmatpush3.bf16.msra.mxu1 %v3102_v62  ;;  %v1216_v3 = vand.u32 4294901760, %v1215_v12 }
 0x1f8   :  { %3104 = vmatprep.subr.bf16.mxu1 %v3263_v57 }
 0x1f9   :  { %v3105_v7 = vpack.c.bf16 %v1223_v1, %v1216_v3 }
 0x2c2   :  { %v1111_v15 = vpop.f32.mrb[0].mxu1 }
 0x2c3   :  { %v1113_v14 = vpop.f32.mrb[1].mxu1 }
 0x2c4   :  { %v1116_v9 = vadd.f32 %v1113_v14, %v1111_v15 }
 0x2c6   :  { %1117 = vrot.lane.b32.xlu1 %v1116_v9, %s3262_s18 }
 0x338   :  { %v1118_v32 = vpop.permute.xlu1 %1117 }
 0x339   :  { %v1119_v44 = vadd.f32 %v1118_v32, %v1116_v9 }
 0x33b   :  { %1120 = vrot.lane.b32.xlu0 %v1119_v44, %s3260_s5 }
 0x3ad   :  { %v1121_v25 = vpop.permute.xlu0 %1120 }
 0x3ae   :  { %v1122_v8 = vadd.f32 %v1121_v25, %v1119_v44  ;;  %v3250_v44 = vld [vmem:[%s4087_s2 + $0x80] sm:$0xff] }
 0x3af   :  { %v2111_v22 = vsel %vm2110_vm8, %v3250_v44, 0  ;;  %v3247_v44 = vld [vmem:[%s4086_s1 + $0xe0] ss:$8 sps:$4 sm:$0xff]  }
 0x3b0   :  { %v1130_v55 = vsel %vm1128_vm6, %v1122_v8, 0  ;;  %v3949_v60 = vand.u32 4294901760, %v2111_v22 }
 0x3b1   :  { %v1201_v5 = vand.u32 4294901760, %v1130_v55 }
 0x3b2   :  { %v3956_v3 = vsub.f32 %v2111_v22, %v3949_v60  ;;  %v3248_v22 = vld [vmem:[%s4086_s1 + $0x170] ss:$8 sps:$4 sm:$0xff]  }
 0x3b3   :  { %v1202_v56 = vsub.f32 %v1130_v55, %v1201_v5 }
 0x3b4   :  { %v2193_v50 = vand.u32 4294901760, %v3956_v3 }
 0x3b5   :  { %v1203_v18 = vand.u32 4294901760, %v1202_v56 }
 0x3b7   :  { %v1204_v36 = vsub.f32 %v1202_v56, %v1203_v18 }
 0x3b9   :  { %v1205_v11 = vand.u32 4294901760, %v1204_v36 }
 0x3bb   :  { %3017 = vmatmul.mubr.f32.vlgmr.msra.gmra.mrb[2].mxu1 %v1205_v11 }
 0x3bc   :  { %3106 = vmatpush3.bf16.msra.mxu1 %v3105_v7  ;;  %3027 = vmatprep.mubr.msk.f32.mxu1 %vm3264_vm5, %v4092_v41  ;;  %v3959_v7 = vand.u32 4294901760, %v2113_v29 }
 0x3bd   :  { %3107 = vmatprep.subr.bf16.mxu1 %v3263_v57 }
 0x3c0   :  { %3109 = vmatpush3.bf16.msra.mxu1 %v3108_v49 }
 0x3c1   :  { %3110 = vmatprep.subr.bf16.mxu1 %v3263_v57 }
 0x3c3   :  { %3028 = vmatmul.mubr.f32.vlgmr.msra.gmra.mrb[2].mxu1 %v1201_v5 }
 0x3c4   :  { %3112 = vmatpush3.bf16.msra.mxu1 %v3111_v27  ;;  %3038 = vmatprep.mubr.msk.f32.mxu1 %vm3264_vm5, %v4092_v41  ;;  %v3962_v27 = vsub.f32 %v2113_v29, %v3959_v7 }
 0x3c5   :  { %3113 = vmatprep.subr.bf16.mxu1 %v3263_v57 }
 0x3c6   :  { %v2204_v55 = vand.u32 4294901760, %v3962_v27 }
 0x3c8   :  { %3115 = vmatpush3.bf16.msra.mxu1 %v3114_v63  ;;  %v2194_v63 = vsub.f32 %v3956_v3, %v2193_v50  ;;  %v2205_v24 = vsub.f32 %v3962_v27, %v2204_v55 }
 0x3c9   :  { %3116 = vmatprep.subr.bf16.mxu1 %v3263_v57 }
 0x3ca   :  { %v2195_v11 = vand.u32 4294901760, %v2194_v63 }
 0x3cb   :  { %3039 = vmatmul.mubr.f32.vlgmr.msra.gmra.mrb[2].mxu1 %v1202_v56 }
 0x3cc   :  { %3118 = vmatpush3.bf16.msra.mxu1 %v3897_v37  ;;  %3049 = vmatprep.mubr.msk.f32.mxu1 %vm3264_vm5, %v4092_v41 }
 0x3cd   :  { %3119 = vmatprep.subr.bf16.mxu1 %v3263_v57 }
 0x3d0   :  { %3121 = vmatpush3.bf16.msra.mxu1 %v3102_v62 }
 0x3d1   :  { %3122 = vmatprep.subr.bf16.mxu1 %v3263_v57 }
 0x3d3   :  { %3050 = vmatmul.mubr.f32.vlgmr.msra.gmra.mrb[2].mxu1 %v1203_v18 }
 0x3d4   :  { %3124 = vmatpush3.bf16.msra.mxu1 %v3123_v0  ;;  %3060 = vmatprep.mubr.msk.f32.mxu1 %vm3264_vm5, %v4092_v41  ;;  %v3252_v0 = vld [vmem:[%s4087_s2 + $0xa0] sm:$0xff] }
 0x3d5   :  { %3125 = vmatprep.subr.bf16.mxu1 %v3263_v57 }
 0x3d8   :  { %3127 = vmatpush3.bf16.msra.mxu1 %v3126_v2  ;;  %v2115_v2 = vsel %vm2110_vm8, %v3252_v0, 0 }
 0x3d9   :  { %3128 = vmatprep.subr.bf16.mxu1 %v3263_v57  ;;  %v3974_v18 = vand.u32 4294901760, %v2115_v2 }
 0x3db   :  { %3061 = vmatmul.mubr.f32.vlgmr.msra.gmra.mrb[2].mxu1 %v1201_v5 }
 0x3dc   :  { %3130 = vmatpush3.bf16.msra.mxu1 %v3897_v37  ;;  %3071 = vmatprep.mubr.msk.f32.mxu1 %vm3264_vm5, %v4092_v41 }
 0x3dd   :  { %3131 = vmatprep.subr.bf16.mxu1 %v3263_v57  ;;  %v1723_v57 = vand.u32 4294901760, %v1722_v16 }
 0x3df   :  { %v1724_v35 = vsub.f32 %v1722_v16, %v1723_v57 }
 0x3e0   :  { %3133 = vmatpush3.bf16.msra.mxu1 %v3102_v62 }
 0x3e1   :  { %v1725_v32 = vand.u32 4294901760, %v1724_v35 }
 0x3e3   :  { %3072 = vmatmul.mubr.f32.vlgmr.msra.gmra.mrb[2].mxu1 %v1201_v5 }
 0x3e4   :  { %2190 = vmatprep.mubr.f32.mxu1 %v4092_v41 }
 0x4b6   :  { %v1613_v15 = vpop.f32.mrb[2].mxu1 }
 0x4b7   :  { %v3134_v14 = vadd.f32 %v1613_v15, %v1127_v53  ;;  %v3073_v9 = vpop.f32.mrb[3].mxu1 }
 0x4b9   :  { %v1617_v6 = vmax.f32 %v3134_v14, 0.0  ;;  %v2206_v14 = vand.u32 4294901760, %v2205_v24 }
 0x4bb   :  { %v1635_v10 = vsel %vm1633_vm7, %v1617_v6, 0 }
 0x4bc   :  { %v1704_v33 = vand.u32 4294901760, %v1635_v10 }
 0x4be   :  { %v1705_v34 = vsub.f32 %v1635_v10, %v1704_v33 }
 0x4c0   :  { %v1706_v39 = vand.u32 4294901760, %v1705_v34 }
 0x4c2   :  { %v1707_v40 = vsub.f32 %v1705_v34, %v1706_v39 }
 0x4c4   :  { %v1708_v37 = vand.u32 4294901760, %v1707_v40  ;;  %v3240_v40 = vld [vmem:[%s4086_s1 + $0x130] ss:$8 sps:$4 sm:$0xff]  }
 0x4c6   :  { %1709 = vmatmul.mubr.f32.vlgmr.msra.gmra.mrb[8].mxu0 %v1708_v37  ;;  %v3243_v37 = vld [vmem:[%s4086_s1 + $0xc0] ss:$8 sps:$4 sm:$0xff]  }
 0x4c7   :  { %1726 = vmatpush1.msra.mxu0 %v1725_v32  ;;  %1789 = vmatprep.mubr.f32.mxu0 %v4092_v41  ;;  %v3241_v32 = vld [vmem:[%s4086_s1 + $0xb0] ss:$8 sps:$4 sm:$0xff]  }
 0x4c8   :  { %1799 = vmatprep.subr.mxu0 %v1716_v43 }
 0x4ce   :  { %1791 = vmatmul.mubr.f32.vlgmr.msra.gmra.mrb[8].mxu0 %v1704_v33 }
 0x4cf   :  { %1802 = vmatpush1.msra.mxu0 %v1722_v16  ;;  %1865 = vmatprep.mubr.f32.mxu0 %v4092_v41  ;;  %v3237_v16 = vld [vmem:[%s4086_s1 + $0x90] ss:$8 sps:$4 sm:$0xff]  }
 0x4d0   :  { %1875 = vmatprep.subr.mxu0 %v1637_v52 }
 0x4d6   :  { %1868 = vmatmul.mubr.f32.vlgmr.msra.gmra.mrb[8].mxu0 %v1705_v34 }
 0x4d7   :  { %1877 = vmatpush1.msra.mxu0 %v1639_v30  ;;  %1940 = vmatprep.mubr.f32.mxu0 %v4092_v41 }
 0x4d8   :  { %1953 = vmatprep.subr.mxu0 %v1717_v58  ;;  %v2214_v58 = vsub.f32 %v2115_v2, %v3974_v18 }
 0x4da   :  { %v2215_v15 = vand.u32 4294901760, %v2214_v58 }
 0x4dc   :  { %v2216_v10 = vsub.f32 %v2214_v58, %v2215_v15 }
 0x4de   :  { %1944 = vmatmul.mubr.f32.vlgmr.msra.gmra.mrb[8].mxu0 %v1706_v39  ;;  %v2217_v35 = vand.u32 4294901760, %v2216_v10  ;;  %v3239_v39 = vld [vmem:[%s4086_s1 + $0xa0] ss:$8 sps:$4 sm:$0xff]  }
 0x4df   :  { %1957 = vmatpush1.msra.mxu0 %v1723_v57  ;;  %2020 = vmatprep.mubr.f32.mxu0 %v4092_v41  ;;  %v3238_v57 = vld [vmem:[%s4086_s1 + $0x120] ss:$8 sps:$4 sm:$0xff]  }
 0x4e0   :  { %2029 = vmatprep.subr.mxu0 %v1637_v52 }
 0x4e6   :  { %2022 = vmatmul.mubr.f32.vlgmr.msra.gmra.mrb[8].mxu0 %v1704_v33 }
 0x4e7   :  { %2031 = vmatpush1.msra.mxu0 %v1639_v30  ;;  %2094 = vmatprep.mubr.f32.mxu0 %v4092_v41  ;;  %v3235_v30 = vld [vmem:[%s4086_s1 + $0x80] ss:$8 sps:$4 sm:$0xff]  }
 0x4ee   :  { %2096 = vmatmul.mubr.f32.vlgmr.msra.gmra.mrb[8].mxu0 %v1704_v33 }
 0x4ef   :  { %2298 = vmatprep.mubr.f32.mxu0 %v4092_v41 }
 0x5c1   :  { %v2097_v62 = vpop.f32.mrb[8].mxu0 }
 0x5c2   :  { %v3135_v13 = vadd.f32 %v2097_v62, %v1626_v28  ;;  %v2099_v42 = vpop.f32.mrb[9].mxu0  ;;  %v3245_v28 = vld [vmem:[%s4086_s1 + $0xd0] ss:$8 sps:$4 sm:$0xff]  }
 0x5c3   :  { %v3136_v12 = vadd.f32 %v2099_v42, %v1630_v51  ;;  %v3246_v51 = vld [vmem:[%s4086_s1 + $0x160] ss:$8 sps:$4 sm:$0xff]   ;;  %v3249_v62 = vld [vmem:[%s4086_s1 + $0xf0] ss:$8 sps:$4 sm:$0xff]  }
 0x5c4   :  { %v2102_v46 = vadd.f32 3.0, %v3135_v13 }
 0x5c5   :  { %v2103_v31 = vadd.f32 3.0, %v3136_v12 }
 0x5c6   :  { %v2104_v1 = vmax.f32 %v2102_v46, 0.0 }
 0x5c7   :  { %v2105_v19 = vmax.f32 %v2103_v31, 0.0 }
 0x5c8   :  { %v2106_v54 = vmin.f32 %v2104_v1, 6.0 }
 0x5c9   :  { %v2107_v26 = vmin.f32 %v2105_v19, 6.0 }
 0x5ca   :  { %v2108_v49 = vmul.f32 0.16666667, %v2106_v54 }
 0x5cb   :  { %v2109_v25 = vmul.f32 0.16666667, %v2107_v26 }
 0x5cc   :  { %v2119_v8 = vsel %vm2117_vm9, %v2108_v49, 0 }
 0x5cd   :  { %v3972_v5 = vand.u32 4294901760, %v2119_v8  ;;  %v2122_v56 = vsel %vm2117_vm9, %v2109_v25, 0 }
 0x5ce   :  { %v2124_v36 = vand.u32 4294901760, %v2122_v56 }
 0x5cf   :  { %v2231_v52 = vsub.f32 %v2119_v8, %v3972_v5 }
 0x5d0   :  { %v2225_v43 = vsub.f32 %v2122_v56, %v2124_v36  ;;  %2125 = vmatprep.subr.mxu1 %v2124_v36 }
 0x5d1   :  { %2127 = vmatpush1.msra.mxu1 %v3972_v5  ;;  %v2232_v61 = vand.u32 4294901760, %v2231_v52 }
 0x5d2   :  { %v2226_v53 = vand.u32 4294901760, %v2225_v43  ;;  %2196 = vmatmul.mubr.f32.vlgmr.msra.gmra.mrb[4].mxu1 %v2195_v11  ;;  %2980 = vmatprep.subr.bf16.mxu1 %v3234_v45 }
 0x5d3   :  { %v2233_v9 = vsub.f32 %v2231_v52, %v2232_v61  ;;  %2201 = vmatprep.mubr.f32.mxu1 %v4092_v41  ;;  %2981 = vmatpush3.bf16.msra.mxu1 %v3235_v30 }
 0x5d4   :  { %v2227_v6 = vsub.f32 %v2225_v43, %v2226_v53  ;;  %2982 = vmatprep.subr.bf16.mxu1 %v3236_v4 }
 0x5d5   :  { %v2234_v34 = vand.u32 4294901760, %v2233_v9 }
 0x5d6   :  { %v2228_v33 = vand.u32 4294901760, %v2227_v6  ;;  %2207 = vmatmul.mubr.f32.gmra.mrb[6].mxu1 %v2206_v14 }
 0x5d7   :  { %2212 = vmatprep.mubr.f32.mxu1 %v4092_v41  ;;  %2983 = vmatpush3.bf16.msra.mxu1 %v3237_v16 }
 0x5d8   :  { %2229 = vmatprep.subr.mxu0 %v2228_v33  ;;  %2984 = vmatprep.subr.bf16.mxu1 %v3238_v57 }
 0x5d9   :  { %2235 = vmatpush1.msra.mxu0 %v2234_v34 }
 0x5da   :  { %2300 = vmatmul.mubr.f32.vlgmr.msra.gmra.mrb[10].mxu0 %v3949_v60  ;;  %2322 = vmatprep.subr.mxu0 %v2225_v43 }
 0x5db   :  { %2325 = vmatpush1.msra.mxu0 %v2231_v52  ;;  %2305 = vmatprep.mubr.f32.mxu0 %v4092_v41 }
 0x5dc   :  { %2414 = vmatprep.subr.mxu0 %v2124_v36  ;;  %2218 = vmatmul.mubr.f32.gmra.mrb[8].mxu1 %v2217_v35 }
 0x5dd   :  { %2985 = vmatpush3.bf16.msra.mxu1 %v3239_v39 }
 0x5de   :  { %2307 = vmatmul.mubr.f32.gmra.mrb[12].mxu0 %v3959_v7  ;;  %2986 = vmatprep.subr.bf16.mxu1 %v3240_v40 }
 0x5df   :  { %2312 = vmatprep.mubr.f32.mxu0 %v4092_v41 }
 0x5e1   :  { %2987 = vmatpush3.bf16.msra.mxu1 %v3241_v32 }
 0x5e2   :  { %2314 = vmatmul.mubr.f32.gmra.mrb[14].mxu0 %v3974_v18 }
 0x5e3   :  { %2388 = vmatprep.mubr.f32.mxu0 %v4092_v41 }
 0x5e6   :  { %2391 = vmatmul.mubr.f32.vlgmr.msra.gmra.mrb[10].mxu0 %v3956_v3 }
 0x5e7   :  { %2416 = vmatpush1.msra.mxu0 %v3972_v5  ;;  %2396 = vmatprep.mubr.f32.mxu0 %v4092_v41 }
 0x5e8   :  { %2510 = vmatprep.subr.mxu0 %v2226_v53 }
 0x5ea   :  { %2399 = vmatmul.mubr.f32.gmra.mrb[12].mxu0 %v3962_v27 }
 0x5eb   :  { %2404 = vmatprep.mubr.f32.mxu0 %v4092_v41 }
 0x5ee   :  { %2407 = vmatmul.mubr.f32.gmra.mrb[14].mxu0 %v2214_v58 }
 0x5ef   :  { %2479 = vmatprep.mubr.f32.mxu0 %v4092_v41 }
 0x5f2   :  { %2483 = vmatmul.mubr.f32.vlgmr.msra.gmra.mrb[10].mxu0 %v2193_v50 }
 0x5f3   :  { %2514 = vmatpush1.msra.mxu0 %v2232_v61  ;;  %2488 = vmatprep.mubr.f32.mxu0 %v4092_v41 }
 0x5f4   :  { %2600 = vmatprep.subr.mxu0 %v2124_v36 }
 0x5f6   :  { %2492 = vmatmul.mubr.f32.gmra.mrb[12].mxu0 %v2204_v55 }
 0x5f7   :  { %2497 = vmatprep.mubr.f32.mxu0 %v4092_v41 }
 0x5fa   :  { %2501 = vmatmul.mubr.f32.gmra.mrb[14].mxu0 %v2215_v15 }
 0x5fb   :  { %2577 = vmatprep.mubr.f32.mxu0 %v4092_v41 }
 0x5fe   :  { %2579 = vmatmul.mubr.f32.vlgmr.msra.gmra.mrb[10].mxu0 %v3949_v60 }
 0x5ff   :  { %2602 = vmatpush1.msra.mxu0 %v3972_v5  ;;  %2584 = vmatprep.mubr.f32.mxu0 %v4092_v41 }
 0x602   :  { %2586 = vmatmul.mubr.f32.gmra.mrb[12].mxu0 %v3959_v7 }
 0x603   :  { %2591 = vmatprep.mubr.f32.mxu0 %v4092_v41 }
 0x606   :  { %2593 = vmatmul.mubr.f32.gmra.mrb[14].mxu0 %v3974_v18 }
 0x607   :  { %2665 = vmatprep.mubr.f32.mxu0 %v4092_v41 }
 0x60a   :  { %2667 = vmatmul.mubr.f32.vlgmr.msra.gmra.mrb[10].mxu0 %v3949_v60 }
 0x60b   :  { %2672 = vmatprep.mubr.f32.mxu0 %v4092_v41 }
 0x60e   :  { %2674 = vmatmul.mubr.f32.gmra.mrb[12].mxu0 %v3959_v7 }
 0x60f   :  { %2679 = vmatprep.mubr.f32.mxu0 %v4092_v41  ;;  %v3242_v41 = vld [vmem:[%s4086_s1 + $0x140] ss:$8 sps:$4 sm:$0xff]  }
 0x610   :  { %2988 = vmatprep.subr.bf16.mxu1 %v3242_v41 }
 0x611   :  { %2989 = vmatpush3.bf16.msra.mxu1 %v3243_v37 }
 0x612   :  { %2681 = vmatmul.mubr.f32.gmra.mrb[14].mxu0 %v3974_v18  ;;  %2990 = vmatprep.subr.bf16.mxu1 %v3244_v47 }
 0x615   :  { %2991 = vmatpush3.bf16.msra.mxu1 %v3245_v28  ;;  %v2759_v28 = vld [vmem:[%s4087_s2 + $0x4] ss:$0 sm:$0xff] }
 0x616   :  { %2992 = vmatprep.subr.bf16.mxu1 %v3246_v51 }
 0x619   :  { %2993 = vmatpush3.bf16.msra.mxu1 %v3247_v44 }
 0x61a   :  { %2994 = vmatprep.subr.bf16.mxu1 %v3248_v22 }
 0x61d   :  { %2995 = vmatpush3.bf16.msra.mxu1 %v3249_v62 }
 0x6a5   :  { %v2197_v13 = vpop.f32.mrb[4].mxu1 }
 0x6a6   :  { %v2199_v42 = vpop.f32.mrb[5].mxu1 }
 0x6a9   :  { %v2208_v12 = vpop.f32.mrb[6].mxu1 }
 0x6aa   :  { %v2210_v60 = vpop.f32.mrb[7].mxu1 }
 0x6af   :  { %v2219_v46 = vpop.f32.mrb[8].mxu1 }
 0x6b0   :  { %v2221_v48 = vpop.f32.mrb[9].mxu1 }
 0x6dd   :  { %v2668_v29 = vpop.f32.mrb[10].mxu0 }
 0x6de   :  { %v3137_v31 = vadd.f32 %v2668_v29, %v2197_v13  ;;  %v2670_v3 = vpop.f32.mrb[11].mxu0 }
 0x6df   :  { %v3138_v1 = vadd.f32 %v2670_v3, %v2199_v42 }
 0x6e0   :  { %v2687_v19 = vmul.f32 %v3137_v31, %v3817_v20 }
 0x6e1   :  { %v2688_v50 = vmul.f32 %v3138_v1, %v3820_v23  ;;  %v2675_v7 = vpop.f32.mrb[12].mxu0 }
 0x6e2   :  { %v2693_v54 = vadd.f32 3.0, %v2687_v19  ;;  %v3139_v26 = vadd.f32 %v2675_v7, %v2208_v12  ;;  %v2677_v49 = vpop.f32.mrb[13].mxu0  ;;  %v3253_v12 = vld [vmem:[%s4088_s0] sm:$0xff] }
 0x6e3   :  { %v2694_v27 = vadd.f32 3.0, %v2688_v50  ;;  %v3140_v63 = vadd.f32 %v2677_v49, %v2210_v60 }
 0x6e4   :  { %v2699_v0 = vmax.f32 %v2693_v54, 0.0  ;;  %v2689_v2 = vmul.f32 %v3139_v26, %v3823_v21  ;;  %v3255_v54 = vld [vmem:[%s4088_s0 + $0x10] sm:$0xff] }
 0x6e5   :  { %v2700_v25 = vmax.f32 %v2694_v27, 0.0  ;;  %v2690_v8 = vmul.f32 %v3140_v63, %v3826_v59  ;;  %v2682_v55 = vpop.f32.mrb[14].mxu0 }
 0x6e6   :  { %v2705_v5 = vmin.f32 %v2699_v0, 6.0  ;;  %v2695_v56 = vadd.f32 3.0, %v2689_v2  ;;  %v3141_v18 = vadd.f32 %v2682_v55, %v2219_v46  ;;  %v2684_v36 = vpop.f32.mrb[15].mxu0 }
 0x6e7   :  { %v2706_v20 = vmin.f32 %v2700_v25, 6.0  ;;  %v2696_v11 = vadd.f32 3.0, %v2690_v8  ;;  %v3142_v23 = vadd.f32 %v2684_v36, %v2221_v48  ;;  %v3254_v48 = vld [vmem:[%s4088_s0 + $0x8] sm:$0xff] }
 0x6e8   :  { %v2701_v24 = vmax.f32 %v2695_v56, 0.0  ;;  %v2691_v45 = vmul.f32 %v3141_v18, %v3858_v38  ;;  %v2711_v43 = vmul.f32 %v2705_v5, %v2687_v19 }
 0x6e9   :  { %v2702_v52 = vmax.f32 %v2696_v11, 0.0  ;;  %v2692_v30 = vmul.f32 %v3142_v23, %v3861_v17  ;;  %v2712_v4 = vmul.f32 %v2706_v20, %v2688_v50 }
 0x6ea   :  { %v2707_v58 = vmin.f32 %v2701_v24, 6.0  ;;  %v2697_v21 = vadd.f32 3.0, %v2691_v45  ;;  %v2717_v16 = vmul.f32 0.16666667, %v2711_v43 }
 0x6eb   :  { %v2708_v61 = vmin.f32 %v2702_v52, 6.0  ;;  %v2698_v59 = vadd.f32 3.0, %v2692_v30  ;;  %v2718_v57 = vmul.f32 0.16666667, %v2712_v4 }
 0x6ec   :  { %v2713_v53 = vmul.f32 %v2707_v58, %v2689_v2  ;;  %v2703_v15 = vmax.f32 %v2697_v21, 0.0 }
 0x6ed   :  { %v2714_v14 = vmul.f32 %v2708_v61, %v2690_v8  ;;  %v2704_v9 = vmax.f32 %v2698_v59, 0.0 }
 0x6ee   :  { %v2719_v6 = vmul.f32 0.16666667, %v2713_v53  ;;  %v2709_v10 = vmin.f32 %v2703_v15, 6.0 }
 0x6ef   :  { %v2720_v33 = vmul.f32 0.16666667, %v2714_v14  ;;  %v2710_v34 = vmin.f32 %v2704_v9, 6.0 }
 0x6f0   :  { %v2755_v38 = vpack.c.bf16 %v2719_v6, %v2717_v16  ;;  %v2715_v17 = vmul.f32 %v2709_v10, %v2691_v45 }
 0x6f1   :  { %v2716_v35 = vmul.f32 %v2710_v34, %v2692_v30  ;;  %v2756_v39 = vpack.c.bf16 %v2720_v33, %v2718_v57 }
 0x6f2   :  { %v2721_v41 = vmul.f32 0.16666667, %v2715_v17 }
 0x6f3   :  { %2888 = vmatprep.mubr.bf16.mxu1 %v2756_v39  ;;  %v2722_v40 = vmul.f32 0.16666667, %v2716_v35 }
 0x6f4   :  { %2889 = vmatmul.mubr.bf16.vlgmr.msra.gmra.mrb[12].mxu1 %v2755_v38  ;;  %v2757_v37 = vpack.c.bf16 %v2721_v41, %v2721_v41 }
 0x6f5   :  { %v2758_v32 = vpack.c.bf16 %v2722_v40, %v2722_v40 }
 0x6f7   :  { %2896 = vmatprep.mubr.bf16.mxu1 %v2758_v32 }
 0x6fc   :  { %2897 = vmatmul.mubr.bf16.gmra.mrb[16].mxu1 %v2757_v37 }
 0x7c7   :  { %v2996_v47 = vpop.f32.mrb[12].mxu1 }
 0x7c8   :  { %v2997_v51 = vpop.f32.mrb[13].mxu1 }
 0x7c9   :  { %v2998_v44 = vadd.f32 %v2997_v51, %v2996_v47  ;;  %v2999_v22 = vpop.f32.mrb[14].mxu1 }
 0x7ca   :  { %v3000_v62 = vpop.f32.mrb[15].mxu1 }
 0x7cb   :  { %v2891_v13 = vadd.f32 %v2998_v44, %v2759_v28  ;;  %v3001_v42 = vadd.f32 %v3000_v62, %v2999_v22 }
 0x7cd   :  { %v2904_v60 = vadd.f32 %v3253_v12, %v2891_v13  ;;  %v2894_v46 = vadd.f32 %v3001_v42, %v2759_v28 }
 0x7cf   :  { %2907 = vst [vmem:[%s4089_s3] sm:$0xff] %v2904_v60  ;;  %v2905_v29 = vadd.f32 %v3254_v48, %v2894_v46  ;;  %v3002_v31 = vpop.f32.mrb[16].mxu1 }
 0x7d0   :  { %v3003_v3 = vpop.f32.mrb[17].mxu1 }
 0x7d1   :  { %2908 = vst [vmem:[%s4089_s3 + $0x8] sm:$0xff] %v2905_v29  ;;  %v3004_v1 = vadd.f32 %v3003_v3, %v3002_v31  ;;  %v3005_v19 = vpop.f32.mrb[18].mxu1 }
 0x7d2   :  { %v3006_v50 = vpop.f32.mrb[19].mxu1 }
 0x7d3   :  { %v2899_v7 = vadd.f32 %v3004_v1, %v2759_v28 }
 0x7d5   :  { %v2906_v26 = vadd.f32 %v3255_v54, %v2899_v7 }
 0x7d7   :  { %2909 = vst [vmem:[%s4089_s3 + $0x10] sm:$0xff] %v2906_v26 }

</bundles_post_ra>
